<compile_context>
chip_gen: v5e
topology: v5e:2x2
jax: 0.10.0
libtpu: 0.0.40
codegen_flags: <defaults>
</compile_context>

<pallas_src>
import math

import jax
import jax.numpy as jnp
from jax import lax
from jax.experimental import pallas as pl
from jax.experimental.pallas import tpu as pltpu

# ------------------------- model hyper-parameters -------------------------
NPAT = 8                    # number of patients (graph nodes)
TIME_STEPS = 6
INPUT_DIMS = [5, 7]         # per-modality input dims
NF0 = sum(INPUT_DIMS)       # 12
NF = 48                     # hidden dim per modality
STATIC_FEATURES = 32
TIME_FEATS = NF * len(INPUT_DIMS)                 # 96
NF2 = TIME_FEATS + STATIC_FEATURES                # 128
NHEADS = 1
ATTN_DK = 32
NCLASS = 4
W_KNN = 3                   # k for kneighbors_graph
EXTRA_GENDER = 8            # extra nodes in dglGraphs[2]/[3]
EXTRA_SERVICE = 8           # extra nodes in dglGraphs[4]/[5]
NBRANCH = 5                 # aft_gnn1..4 + aft_gnn_dy

XDIM = TIME_STEPS * NF0                 # 72  : flattened time input width
N3 = NPAT + EXTRA_GENDER                # 16  : gc3 graphs node count
N4 = NPAT + EXTRA_SERVICE               # 16  : gc4 graphs node count
NAB = 3 * NPAT + N3 + N4                # 56  : merged first-hop GAT node count
NC = N3 + N4                            # 32  : merged second-hop GAT node count

# vec-slab row offsets (all multiples of 8)
V_AL_AB = 8
V_AR_AB = V_AL_AB + NAB                 # 64
V_B_AB = V_AR_AB + NAB                  # 120
V_AL_C = V_B_AB + NAB                   # 176
V_AR_C = V_AL_C + NC                    # 208
V_B_C = V_AR_C + NC                     # 240
V_ROWS = V_B_C + NC                     # 272

# w_big lane offsets (all multiples of 128)
WB_CAT = 0                              # 5 first-hop fc weights (640 lanes)
WB_MID = WB_CAT + NBRANCH * NF2         # 640 : [w31 | w41]
WB_QK = WB_MID + 2 * NF2                # 896 : Wq @ Wk^T
WB_TOP = WB_QK + NF2                    # 1024: head weight (aft_rnn_last part)
WB_BOT = WB_TOP + NF2                   # 1152: head weight (merged part)
WB_LANES = WB_BOT + NF2                 # 1280

_VMEM = pl.BlockSpec(memory_space=pltpu.MemorySpace.VMEM)


# ------------------------------ in-kernel helpers ------------------------------
def _gat(z, adj, a_l, a_r, bias):
    """Block-diagonal-batched dense single-head DGL-style GATConv fused with the
    outer F.leaky_relu(0.01).  a_l / a_r / bias are per-node tiles of that node's
    original layer parameters; adj[i, j] == 1 means node j sends a message to i
    (blocks never mix because adj is block-diagonal)."""
    f32 = jnp.float32
    # el[i, j] = a_l_blk(i) . z_j   (MXU contraction; avoids a sublane->lane relayout)
    el = lax.dot_general(a_l, z, (((1,), (1,)), ((), ())),
                         preferred_element_type=f32)            # (N, N)
    er = jnp.sum(z * a_r, axis=-1, keepdims=True)               # (N, 1) dest term
    e = el + er
    e = jnp.where(e > 0, e, 0.2 * e)                            # GATConv leaky_relu(0.2)
    mask = adj > 0
    e_m = jnp.where(mask, e, f32(-1e30))
    m = jnp.max(e_m, axis=-1, keepdims=True)
    p = jnp.where(mask, jnp.exp(e_m - m), 0.0)
    denom = jnp.sum(p, axis=-1, keepdims=True)
    alpha = p * pl.reciprocal(jnp.maximum(denom, f32(1e-20)), approx=True)
    rst = jnp.dot(alpha, z, preferred_element_type=f32) + bias
    return jnp.where(rst > 0, rst, 0.01 * rst)                  # fused outer F.leaky_relu


# ------------------------------ fused Pallas kernel -----------------------------
def fused_forward_kernel(x_ref, static_ref, win_ref, wbig_ref, vec_ref,
                         adjAB_ref, adjC_ref, out_ref, adj_scr):
    f32 = jnp.float32

    # ---- time layer (mean-over-time folded into the weight) + static lane-lift ----
    # TODO(synk): TAMDUR_Layer source is not provided; substituted with a
    # deterministic mean-over-time pooling + linear projection (dropout = identity).
    aft = (jnp.dot(x_ref[...], win_ref[0:XDIM, :], preferred_element_type=f32)
           + jnp.dot(static_ref[...], win_ref[XDIM:XDIM + STATIC_FEATURES, :],
                     preferred_element_type=f32)
           + vec_ref[0:1, :])                                   # (npat, nF2) aft_rnn_last

    # ---- dynamic kNN graph on the time features only (lanes < TIME_FEATS) ----
    # Replaces sklearn.kneighbors_graph(include_self=True) + dgl.from_scipy with a
    # k-step masked-min selection computed entirely in VMEM (no XLA argsort).
    lane = lax.broadcasted_iota(jnp.int32, (NPAT, NF2), 1)
    feat = jnp.where(lane < TIME_FEATS, aft, 0.0)
    sq = jnp.sum(feat * feat, axis=-1, keepdims=True)           # (npat, 1)
    gram = lax.dot_general(feat, feat, (((1,), (1,)), ((), ())),
                           preferred_element_type=f32)          # (npat, npat)
    # Within column i, ordering of (sq_j - 2*gram[j,i]) == ordering of ||x_j - x_i||^2,
    # so a column-wise k-min directly builds the receiver-row adjacency (A^T).
    score = sq - 2.0 * gram
    row_idx = lax.broadcasted_iota(jnp.int32, (NPAT, NPAT), 0).astype(f32)
    adj_dy = jnp.zeros((NPAT, NPAT), f32)
    for _ in range(W_KNN):
        cmin = jnp.min(score, axis=0, keepdims=True)
        is_min = score <= cmin
        first = jnp.min(jnp.where(is_min, row_idx, f32(NPAT)),
                        axis=0, keepdims=True)                  # smallest-index tie-break
        sel = row_idx == first
        adj_dy = jnp.where(sel, 1.0, adj_dy)
        score = jnp.where(sel, f32(1e30), score)

    # ---- 56-node block-diag adjacency: precomputed static blocks + dynamic dy ----
    adj_scr[...] = adjAB_ref[...]
    adj_scr[0:NPAT, 0:NPAT] = adj_dy
    adjAB = adj_scr[...]

    # ---- ONE wide fc matmul feeds all 5 first-hop GAT branches ----
    zall = jnp.dot(aft, wbig_ref[:, WB_CAT:WB_MID], preferred_element_type=f32)  # (8,640)
    zeros8 = jnp.zeros((NPAT, NF2), f32)          # gender / service zero-feature nodes
    zAB = jnp.concatenate(
        [zall[:, 0:NF2], zall[:, NF2:2 * NF2], zall[:, 2 * NF2:3 * NF2],
         zall[:, 3 * NF2:4 * NF2], zeros8,
         zall[:, 4 * NF2:5 * NF2], zeros8], axis=0)              # (56, 128)

    # One block-diagonal GAT replaces gcDy + gc1 + gc2 + gc3_0 + gc4_0.
    hAB = _gat(zAB, adjAB,
               vec_ref[V_AL_AB:V_AR_AB, :], vec_ref[V_AR_AB:V_B_AB, :],
               vec_ref[V_B_AB:V_AL_C, :])                        # (56, 128)

    # ---- second hop (gc3_1 / gc4_1) batched as one 32-node block-diag GAT ----
    hB = hAB[3 * NPAT:NAB, :]                                    # (32, 128): [h3; h4]
    wide = jnp.dot(hB, wbig_ref[:, WB_MID:WB_QK], preferred_element_type=f32)  # (32,256)
    rowC = lax.broadcasted_iota(jnp.int32, (NC, NF2), 0)
    zC = jnp.where(rowC < N3, wide[:, 0:NF2], wide[:, NF2:2 * NF2])  # [h3@w31 ; h4@w41]
    hC = _gat(zC, adjC_ref[...],
              vec_ref[V_AL_C:V_AR_C, :], vec_ref[V_AR_C:V_B_C, :],
              vec_ref[V_B_C:V_ROWS, :])                          # (32, 128)

    aft_dy = hAB[0:NPAT]
    aft1 = hAB[NPAT:2 * NPAT]
    aft2 = hAB[2 * NPAT:3 * NPAT]
    aft3 = hC[0:NPAT]
    aft4 = hC[N3:N3 + NPAT]

    # ---- QKV attention merger: score_n = rowsum(branch_n * (h Wq Wk^T + bq Wk^T)) ----
    # bk is dropped: its q.bk score term is constant across the 5 branches and
    # cancels inside the softmax.
    qk = (jnp.dot(aft, wbig_ref[:, WB_QK:WB_TOP], preferred_element_type=f32)
          + vec_ref[1:2, :])                                     # (npat, nF2)
    branches = (aft1, aft2, aft3, aft4, aft_dy)                  # torch cat order
    inv_sqrt_dk = f32(1.0 / math.sqrt(ATTN_DK))
    scores = [jnp.sum(b * qk, axis=-1, keepdims=True) * inv_sqrt_dk
              for b in branches]                                 # 5 x (npat, 1)
    smax = scores[0]
    for s in scores[1:]:
        smax = jnp.maximum(smax, s)
    ps = [jnp.exp(s - smax) for s in scores]
    denom = ps[0]
    for p in ps[1:]:
        denom = denom + p
    inv_denom = pl.reciprocal(denom, approx=True)
    merged = (ps[0] * inv_denom) * branches[0]
    for p, b in zip(ps[1:], branches[1:]):
        merged = merged + (p * inv_denom) * b                    # (npat, nF2)

    # ---- head: linear (split, lane-dense padded weights) + log_softmax ----
    # Padded class columns carry bias -1e30 so they vanish under log_softmax;
    # the wrapper slices the first NCLASS lanes.
    logits = (jnp.dot(aft, wbig_ref[:, WB_TOP:WB_BOT], preferred_element_type=f32)
              + jnp.dot(merged, wbig_ref[:, WB_BOT:WB_LANES], preferred_element_type=f32)
              + vec_ref[2:3, :])                                 # (npat, nF2)
    m = jnp.max(logits, axis=-1, keepdims=True)
    s = logits - m
    lse = jnp.log(jnp.sum(jnp.exp(s), axis=-1, keepdims=True))
    out_ref[...] = s - lse                                       # lane-dense store


# ------------------------------ one-time packing ------------------------------
def pack_inputs(params, adjs):
    """Pack all weights + graph adjacencies into a handful of VMEM slabs.
    Runs ONCE at init — not on the per-call forward path."""
    f32 = jnp.float32

    # Input-projection slab: mean-over-time folded into a pre-tiled (1/T) weight,
    # static features lane-lifted to lanes [TIME_FEATS, NF2) by an identity block.
    w_time = jnp.tile(params["time_w"], (TIME_STEPS, 1)) / TIME_STEPS      # (72, 96)
    w_time = jnp.pad(w_time, ((0, 0), (0, NF2 - TIME_FEATS)))              # (72, 128)
    lift = jnp.zeros((STATIC_FEATURES, NF2), f32)
    lift = lift.at[jnp.arange(STATIC_FEATURES),
                   TIME_FEATS + jnp.arange(STATIC_FEATURES)].set(1.0)      # (32, 128)
    w_in = jnp.concatenate([w_time, lift], axis=0)                         # (104, 128)

    w_dy, al_dy, ar_dy, b_dy = params["gcDy"]
    w_1, al_1, ar_1, b_1 = params["gc1"]
    w_2, al_2, ar_2, b_2 = params["gc2"]
    w_30, al_30, ar_30, b_30 = params["gc3_0"]
    w_31, al_31, ar_31, b_31 = params["gc3_1"]
    w_40, al_40, ar_40, b_40 = params["gc4_0"]
    w_41, al_41, ar_41, b_41 = params["gc4_1"]

    # Merger K projection folded: Wq Wk^T and bq Wk^T.  bk is intentionally unused
    # (its q.bk score term is constant across branches -> cancels in the softmax).
    w_qk = params["wq"] @ params["wk"].T                                   # (128, 128)
    b_qk = params["bq"] @ params["wk"].T                                   # (1, 128)

    # Head weights split (aft_rnn_last part / merged part) and padded lane-dense.
    ow_top = jnp.pad(params["out_w"][:NF2], ((0, 0), (0, NF2 - NCLASS)))
    ow_bot = jnp.pad(params["out_w"][NF2:], ((0, 0), (0, NF2 - NCLASS)))
    ob = jnp.full((1, NF2), -1e30, f32).at[:, :NCLASS].set(params["out_b"])

    w_big = jnp.concatenate([w_dy, w_1, w_2, w_30, w_40,      # first-hop fc (640 lanes)
                             w_31, w_41,                      # second-hop fc (256 lanes)
                             w_qk, ow_top, ow_bot], axis=1)   # (128, 1280)

    # Vector slab: biases + per-node attention tiles for the block-diag batched GATs.
    time_b = jnp.pad(params["time_b"], ((0, 0), (0, NF2 - TIME_FEATS)))

    def tiles(pairs):
        return jnp.concatenate([jnp.tile(v, (n, 1)) for v, n in pairs], axis=0)

    al_AB = tiles([(al_dy, NPAT), (al_1, NPAT), (al_2, NPAT), (al_30, N3), (al_40, N4)])
    ar_AB = tiles([(ar_dy, NPAT), (ar_1, NPAT), (ar_2, NPAT), (ar_30, N3), (ar_40, N4)])
    b_AB = tiles([(b_dy, NPAT), (b_1, NPAT), (b_2, NPAT), (b_30, N3), (b_40, N4)])
    al_C = tiles([(al_31, N3), (al_41, N4)])
    ar_C = tiles([(ar_31, N3), (ar_41, N4)])
    b_C = tiles([(b_31, N3), (b_41, N4)])
    vec = jnp.concatenate([time_b, b_qk, ob, jnp.zeros((V_AL_AB - 3, NF2), f32),
                           al_AB, ar_AB, b_AB, al_C, ar_C, b_C], axis=0)   # (272, 128)

    # Block-diagonal adjacencies (receiver-row convention).
    def block_diag(blocks):
        n = sum(b.shape[0] for b in blocks)
        out = jnp.zeros((n, n), f32)
        off = 0
        for b in blocks:
            k = b.shape[0]
            out = out.at[off:off + k, off:off + k].set(b)
            off += k
        return out

    # TODO(synk): DGL graph objects replaced by dense receiver-row adjacency matrices.
    adjAB = block_diag([jnp.zeros((NPAT, NPAT), f32),   # dy block filled in-kernel
                        adjs[0], adjs[1], adjs[2], adjs[4]])               # (56, 56)
    adjC = block_diag([adjs[3], adjs[5]])                                  # (32, 32)

    return dict(w_in=w_in, w_big=w_big, vec=vec, adjAB=adjAB, adjC=adjC)


# ------------------------------ forward wrapper ------------------------------
def merge_tamdur_forward(packed, input_tensor, static_tensor):
    npat = input_tensor.shape[0]
    x_flat = input_tensor.reshape(npat, XDIM)          # row-major no-op reshape
    args = (x_flat, static_tensor, packed["w_in"], packed["w_big"], packed["vec"],
            packed["adjAB"], packed["adjC"])
    out_pad = pl.pallas_call(
        fused_forward_kernel,
        out_shape=jax.ShapeDtypeStruct((npat, NF2), jnp.float32),
        in_specs=[_VMEM] * len(args),
        out_specs=_VMEM,
        scratch_shapes=[pltpu.VMEM((NAB, NAB), jnp.float32)],
        cost_estimate=pl.CostEstimate(flops=7_000_000, transcendentals=6_000,
                                      bytes_accessed=1_200_000),
    )(*args)
    return out_pad[:, :NCLASS]                          # log-probs (npat, NCLASS)


# ------------------------------ parameter init ------------------------------
def init_params(key):
    def nrm(key, shape, scale=0.1):
        return scale * jax.random.normal(key, shape, jnp.float32)

    keys = iter(jax.random.split(key, 64))
    params = {
        "time_w": nrm(next(keys), (NF0, TIME_FEATS)),
        "time_b": nrm(next(keys), (1, TIME_FEATS)),
        "wq": nrm(next(keys), (NF2, ATTN_DK)),
        "bq": nrm(next(keys), (1, ATTN_DK)),
        "wk": nrm(next(keys), (NF2, ATTN_DK)),
        "bk": nrm(next(keys), (1, ATTN_DK)),   # unused: cancels inside the merger softmax
        "out_w": nrm(next(keys), (2 * NF2, NCLASS)),
        "out_b": nrm(next(keys), (1, NCLASS)),
    }
    for name in ("gcDy", "gc1", "gc2", "gc3_0", "gc3_1", "gc4_0", "gc4_1"):
        params[name] = (
            nrm(next(keys), (NF2, NF2)),   # fc weight
            nrm(next(keys), (1, NF2)),     # attn_l
            nrm(next(keys), (1, NF2)),     # attn_r
            nrm(next(keys), (1, NF2)),     # bias
        )
    return params


def rand_adj(key, n, p=0.4):
    a = jax.random.bernoulli(key, p, (n, n)).astype(jnp.float32)
    return jnp.maximum(a, jnp.eye(n, dtype=jnp.float32))


# ----------------------------------- main -----------------------------------
if __name__ == "__main__":
    root = jax.random.PRNGKey(0)
    k_param, k_x, k_s, *k_adj = jax.random.split(root, 9)

    params = init_params(k_param)

    input_tensor = jax.random.normal(k_x, (NPAT, TIME_STEPS, NF0), jnp.float32)
    static_tensor = jax.random.normal(k_s, (NPAT, STATIC_FEATURES), jnp.float32)

    adjs = [
        rand_adj(k_adj[0], NPAT),
        rand_adj(k_adj[1], NPAT),
        rand_adj(k_adj[2], N3),
        rand_adj(k_adj[3], N3),
        rand_adj(k_adj[4], N4),
        rand_adj(k_adj[5], N4),
    ]

    # One-time weight/graph packing (NOT on the per-call forward path).
    packed = pack_inputs(params, adjs)
    packed = jax.tree_util.tree_map(jax.block_until_ready, packed)

    fwd = jax.jit(merge_tamdur_forward)
    out = fwd(packed, input_tensor, static_tensor)
    out = jax.block_until_ready(out)

    assert out.shape == (NPAT, NCLASS)
    assert bool(jnp.all(jnp.isfinite(out)))
    # rows of log_softmax must sum to ~1 in prob space
    assert bool(jnp.allclose(jnp.sum(jnp.exp(out), axis=1), 1.0, atol=1e-4))
    print("KERNEL_OK")
</pallas_src>

<mosaic_0001>
module attributes {stable_mosaic.version = 11 : i64} {
  func.func @fused_forward_kernel(%arg0: memref<8x72xf32, #tpu.memory_space<vmem>>, %arg1: memref<8x32xf32, #tpu.memory_space<vmem>>, %arg2: memref<104x128xf32, #tpu.memory_space<vmem>>, %arg3: memref<128x1280xf32, #tpu.memory_space<vmem>>, %arg4: memref<272x128xf32, #tpu.memory_space<vmem>>, %arg5: memref<56x56xf32, #tpu.memory_space<vmem>>, %arg6: memref<32x32xf32, #tpu.memory_space<vmem>>, %arg7: memref<8x128xf32, #tpu.memory_space<vmem>>, %arg8: memref<56x56xf32, #tpu.memory_space<vmem>>) attributes {dimension_semantics = [], scalar_prefetch = 0 : i64, scratch_operands = 1 : i64, tpu.core_type = #tpu.core_type<tc>} {
    %c0 = arith.constant 0 : index
    %c0_0 = arith.constant 0 : index
    %0 = vector.load %arg0[%c0, %c0_0] : memref<8x72xf32, #tpu.memory_space<vmem>>, vector<8x72xf32>
    %c0_1 = arith.constant 0 : index
    %c0_2 = arith.constant 0 : index
    %1 = vector.load %arg2[%c0_1, %c0_2] : memref<104x128xf32, #tpu.memory_space<vmem>>, vector<72x128xf32>
    %cst = arith.constant dense<0.000000e+00> : vector<8x128xf32>
    %2 = tpu.matmul %0, %1, %cst {dimension_numbers = #tpu.dot_dimension_numbers<[1], [0], [0], [1], [0, 0, 1, 1], [], []>} : vector<8x72xf32>, vector<72x128xf32>, vector<8x128xf32> -> vector<8x128xf32>
    %c0_3 = arith.constant 0 : index
    %c0_4 = arith.constant 0 : index
    %3 = vector.load %arg1[%c0_3, %c0_4] : memref<8x32xf32, #tpu.memory_space<vmem>>, vector<8x32xf32>
    %c72 = arith.constant 72 : index
    %c0_5 = arith.constant 0 : index
    %4 = vector.load %arg2[%c72, %c0_5] : memref<104x128xf32, #tpu.memory_space<vmem>>, vector<32x128xf32>
    %cst_6 = arith.constant dense<0.000000e+00> : vector<8x128xf32>
    %5 = tpu.matmul %3, %4, %cst_6 {dimension_numbers = #tpu.dot_dimension_numbers<[1], [0], [0], [1], [0, 0, 1, 1], [], []>} : vector<8x32xf32>, vector<32x128xf32>, vector<8x128xf32> -> vector<8x128xf32>
    %6 = arith.addf %2, %5 : vector<8x128xf32>
    %c0_7 = arith.constant 0 : index
    %c0_8 = arith.constant 0 : index
    %7 = vector.load %arg4[%c0_7, %c0_8] : memref<272x128xf32, #tpu.memory_space<vmem>>, vector<1x128xf32>
    %8 = vector.broadcast %7 : vector<1x128xf32> to vector<8x128xf32>
    %9 = arith.addf %6, %8 : vector<8x128xf32>
    %10 = tpu.iota {dimensions = array<i32: 1>} : vector<8x128xi32>
    %c96_i32 = arith.constant 96 : i32
    %11 = vector.broadcast %c96_i32 : i32 to vector<8x128xi32>
    %12 = arith.cmpi slt, %10, %11 : vector<8x128xi32>
    %cst_9 = arith.constant 0.000000e+00 : f32
    %13 = vector.broadcast %cst_9 : f32 to vector<8x128xf32>
    %14 = arith.select %12, %9, %13 : vector<8x128xi1>, vector<8x128xf32>
    %15 = arith.mulf %14, %14 : vector<8x128xf32>
    %cst_10 = arith.constant dense<0.000000e+00> : vector<8xf32>
    %16 = vector.multi_reduction <add>, %15, %cst_10 [1] : vector<8x128xf32> to vector<8xf32>
    %17 = vector.shape_cast %16 : vector<8xf32> to vector<8x1xf32>
    %cst_11 = arith.constant dense<0.000000e+00> : vector<8x8xf32>
    %18 = tpu.matmul %14, %14, %cst_11 {dimension_numbers = #tpu.dot_dimension_numbers<[1], [1], [0], [0], [0, 0, 1, 0], [], []>} : vector<8x128xf32>, vector<8x128xf32>, vector<8x8xf32> -> vector<8x8xf32>
    %cst_12 = arith.constant 2.000000e+00 : f32
    %19 = vector.broadcast %cst_12 : f32 to vector<8x8xf32>
    %20 = arith.mulf %19, %18 : vector<8x8xf32>
    %21 = vector.broadcast %17 : vector<8x1xf32> to vector<8x8xf32>
    %22 = arith.subf %21, %20 : vector<8x8xf32>
    %23 = tpu.iota {dimensions = array<i32: 0>} : vector<8x8xi32>
    %24 = arith.sitofp %23 : vector<8x8xi32> to vector<8x8xf32>
    %cst_13 = arith.constant 0.000000e+00 : f32
    %25 = vector.broadcast %cst_13 : f32 to vector<8x8xf32>
    %cst_14 = arith.constant dense<0x7F800000> : vector<8xf32>
    %26 = vector.multi_reduction <minimumf>, %22, %cst_14 [0] : vector<8x8xf32> to vector<8xf32>
    %27 = vector.shape_cast %26 : vector<8xf32> to vector<1x8xf32>
    %28 = vector.broadcast %27 : vector<1x8xf32> to vector<8x8xf32>
    %29 = arith.cmpf ole, %22, %28 : vector<8x8xf32>
    %cst_15 = arith.constant 8.000000e+00 : f32
    %30 = vector.broadcast %cst_15 : f32 to vector<8x8xf32>
    %31 = arith.select %29, %24, %30 : vector<8x8xi1>, vector<8x8xf32>
    %cst_16 = arith.constant dense<0x7F800000> : vector<8xf32>
    %32 = vector.multi_reduction <minimumf>, %31, %cst_16 [0] : vector<8x8xf32> to vector<8xf32>
    %33 = vector.shape_cast %32 : vector<8xf32> to vector<1x8xf32>
    %34 = vector.broadcast %33 : vector<1x8xf32> to vector<8x8xf32>
    %35 = arith.cmpf oeq, %24, %34 : vector<8x8xf32>
    %cst_17 = arith.constant 1.000000e+00 : f32
    %36 = vector.broadcast %cst_17 : f32 to vector<8x8xf32>
    %37 = arith.select %35, %36, %25 : vector<8x8xi1>, vector<8x8xf32>
    %cst_18 = arith.constant 1.000000e+30 : f32
    %38 = vector.broadcast %cst_18 : f32 to vector<8x8xf32>
    %39 = arith.select %35, %38, %22 : vector<8x8xi1>, vector<8x8xf32>
    %cst_19 = arith.constant dense<0x7F800000> : vector<8xf32>
    %40 = vector.multi_reduction <minimumf>, %39, %cst_19 [0] : vector<8x8xf32> to vector<8xf32>
    %41 = vector.shape_cast %40 : vector<8xf32> to vector<1x8xf32>
    %42 = vector.broadcast %41 : vector<1x8xf32> to vector<8x8xf32>
    %43 = arith.cmpf ole, %39, %42 : vector<8x8xf32>
    %cst_20 = arith.constant 8.000000e+00 : f32
    %44 = vector.broadcast %cst_20 : f32 to vector<8x8xf32>
    %45 = arith.select %43, %24, %44 : vector<8x8xi1>, vector<8x8xf32>
    %cst_21 = arith.constant dense<0x7F800000> : vector<8xf32>
    %46 = vector.multi_reduction <minimumf>, %45, %cst_21 [0] : vector<8x8xf32> to vector<8xf32>
    %47 = vector.shape_cast %46 : vector<8xf32> to vector<1x8xf32>
    %48 = vector.broadcast %47 : vector<1x8xf32> to vector<8x8xf32>
    %49 = arith.cmpf oeq, %24, %48 : vector<8x8xf32>
    %cst_22 = arith.constant 1.000000e+00 : f32
    %50 = vector.broadcast %cst_22 : f32 to vector<8x8xf32>
    %51 = arith.select %49, %50, %37 : vector<8x8xi1>, vector<8x8xf32>
    %cst_23 = arith.constant 1.000000e+30 : f32
    %52 = vector.broadcast %cst_23 : f32 to vector<8x8xf32>
    %53 = arith.select %49, %52, %39 : vector<8x8xi1>, vector<8x8xf32>
    %cst_24 = arith.constant dense<0x7F800000> : vector<8xf32>
    %54 = vector.multi_reduction <minimumf>, %53, %cst_24 [0] : vector<8x8xf32> to vector<8xf32>
    %55 = vector.shape_cast %54 : vector<8xf32> to vector<1x8xf32>
    %56 = vector.broadcast %55 : vector<1x8xf32> to vector<8x8xf32>
    %57 = arith.cmpf ole, %53, %56 : vector<8x8xf32>
    %cst_25 = arith.constant 8.000000e+00 : f32
    %58 = vector.broadcast %cst_25 : f32 to vector<8x8xf32>
    %59 = arith.select %57, %24, %58 : vector<8x8xi1>, vector<8x8xf32>
    %cst_26 = arith.constant dense<0x7F800000> : vector<8xf32>
    %60 = vector.multi_reduction <minimumf>, %59, %cst_26 [0] : vector<8x8xf32> to vector<8xf32>
    %61 = vector.shape_cast %60 : vector<8xf32> to vector<1x8xf32>
    %62 = vector.broadcast %61 : vector<1x8xf32> to vector<8x8xf32>
    %63 = arith.cmpf oeq, %24, %62 : vector<8x8xf32>
    %cst_27 = arith.constant 1.000000e+00 : f32
    %64 = vector.broadcast %cst_27 : f32 to vector<8x8xf32>
    %65 = arith.select %63, %64, %51 : vector<8x8xi1>, vector<8x8xf32>
    %c0_28 = arith.constant 0 : index
    %c0_29 = arith.constant 0 : index
    %66 = vector.load %arg5[%c0_28, %c0_29] : memref<56x56xf32, #tpu.memory_space<vmem>>, vector<56x56xf32>
    %c0_30 = arith.constant 0 : index
    %c0_31 = arith.constant 0 : index
    %67 = vector.load %arg8[%c0_30, %c0_31] : memref<56x56xf32, #tpu.memory_space<vmem>>, vector<56x56xf32>
    tpu.vector_store %arg8[%c0_30, %c0_31], %66 {strides = array<i32>} : memref<56x56xf32, #tpu.memory_space<vmem>>, vector<56x56xf32>,
    %c0_32 = arith.constant 0 : index
    %c0_33 = arith.constant 0 : index
    %68 = vector.load %arg8[%c0_32, %c0_33] : memref<56x56xf32, #tpu.memory_space<vmem>>, vector<8x8xf32>
    tpu.vector_store %arg8[%c0_32, %c0_33], %65 {strides = array<i32>} : memref<56x56xf32, #tpu.memory_space<vmem>>, vector<8x8xf32>,
    %c0_34 = arith.constant 0 : index
    %c0_35 = arith.constant 0 : index
    %69 = vector.load %arg8[%c0_34, %c0_35] : memref<56x56xf32, #tpu.memory_space<vmem>>, vector<56x56xf32>
    %c0_36 = arith.constant 0 : index
    %c0_37 = arith.constant 0 : index
    %70 = vector.load %arg3[%c0_36, %c0_37] : memref<128x1280xf32, #tpu.memory_space<vmem>>, vector<128x640xf32>
    %cst_38 = arith.constant dense<0.000000e+00> : vector<8x640xf32>
    %71 = tpu.matmul %9, %70, %cst_38 {dimension_numbers = #tpu.dot_dimension_numbers<[1], [0], [0], [1], [0, 0, 1, 1], [], []>} : vector<8x128xf32>, vector<128x640xf32>, vector<8x640xf32> -> vector<8x640xf32>
    %cst_39 = arith.constant 0.000000e+00 : f32
    %72 = vector.broadcast %cst_39 : f32 to vector<8x128xf32>
    %73 = vector.extract_strided_slice %71 {offsets = [0, 0], sizes = [8, 128], strides = [1, 1]} : vector<8x640xf32> to vector<8x128xf32>
    %74 = vector.extract_strided_slice %71 {offsets = [0, 128], sizes = [8, 128], strides = [1, 1]} : vector<8x640xf32> to vector<8x128xf32>
    %75 = vector.extract_strided_slice %71 {offsets = [0, 256], sizes = [8, 128], strides = [1, 1]} : vector<8x640xf32> to vector<8x128xf32>
    %76 = vector.extract_strided_slice %71 {offsets = [0, 384], sizes = [8, 128], strides = [1, 1]} : vector<8x640xf32> to vector<8x128xf32>
    %77 = vector.extract_strided_slice %71 {offsets = [0, 512], sizes = [8, 128], strides = [1, 1]} : vector<8x640xf32> to vector<8x128xf32>
    %78 = tpu.concatenate %73, %74, %75, %76, %72, %77, %72 in 0 : vector<8x128xf32>, vector<8x128xf32>, vector<8x128xf32>, vector<8x128xf32>, vector<8x128xf32>, vector<8x128xf32>, vector<8x128xf32> -> vector<56x128xf32>
    %c8 = arith.constant 8 : index
    %c0_40 = arith.constant 0 : index
    %79 = vector.load %arg4[%c8, %c0_40] : memref<272x128xf32, #tpu.memory_space<vmem>>, vector<56x128xf32>
    %c64 = arith.constant 64 : index
    %c0_41 = arith.constant 0 : index
    %80 = vector.load %arg4[%c64, %c0_41] : memref<272x128xf32, #tpu.memory_space<vmem>>, vector<56x128xf32>
    %c120 = arith.constant 120 : index
    %c0_42 = arith.constant 0 : index
    %81 = vector.load %arg4[%c120, %c0_42] : memref<272x128xf32, #tpu.memory_space<vmem>>, vector<56x128xf32>
    %cst_43 = arith.constant dense<0.000000e+00> : vector<56x56xf32>
    %82 = tpu.matmul %79, %78, %cst_43 {dimension_numbers = #tpu.dot_dimension_numbers<[1], [1], [0], [0], [0, 0, 1, 0], [], []>} : vector<56x128xf32>, vector<56x128xf32>, vector<56x56xf32> -> vector<56x56xf32>
    %83 = arith.mulf %78, %80 : vector<56x128xf32>
    %cst_44 = arith.constant dense<0.000000e+00> : vector<56xf32>
    %84 = vector.multi_reduction <add>, %83, %cst_44 [1] : vector<56x128xf32> to vector<56xf32>
    %85 = vector.shape_cast %84 : vector<56xf32> to vector<56x1xf32>
    %86 = vector.broadcast %85 : vector<56x1xf32> to vector<56x56xf32>
    %87 = arith.addf %82, %86 : vector<56x56xf32>
    %cst_45 = arith.constant 0.000000e+00 : f32
    %88 = vector.broadcast %cst_45 : f32 to vector<56x56xf32>
    %89 = arith.cmpf ogt, %87, %88 : vector<56x56xf32>
    %cst_46 = arith.constant 2.000000e-01 : f32
    %90 = vector.broadcast %cst_46 : f32 to vector<56x56xf32>
    %91 = arith.mulf %90, %87 : vector<56x56xf32>
    %92 = arith.select %89, %87, %91 : vector<56x56xi1>, vector<56x56xf32>
    %cst_47 = arith.constant 0.000000e+00 : f32
    %93 = vector.broadcast %cst_47 : f32 to vector<56x56xf32>
    %94 = arith.cmpf ogt, %69, %93 : vector<56x56xf32>
    %cst_48 = arith.constant -1.000000e+30 : f32
    %95 = vector.broadcast %cst_48 : f32 to vector<56x56xf32>
    %96 = arith.select %94, %92, %95 : vector<56x56xi1>, vector<56x56xf32>
    %cst_49 = arith.constant dense<0xFF800000> : vector<56xf32>
    %97 = vector.multi_reduction <maximumf>, %96, %cst_49 [1] : vector<56x56xf32> to vector<56xf32>
    %98 = vector.shape_cast %97 : vector<56xf32> to vector<56x1xf32>
    %99 = vector.broadcast %98 : vector<56x1xf32> to vector<56x56xf32>
    %100 = arith.subf %96, %99 : vector<56x56xf32>
    %101 = math.exp %100 : vector<56x56xf32>
    %cst_50 = arith.constant 0.000000e+00 : f32
    %102 = vector.broadcast %cst_50 : f32 to vector<56x56xf32>
    %103 = arith.select %94, %101, %102 : vector<56x56xi1>, vector<56x56xf32>
    %cst_51 = arith.constant dense<0.000000e+00> : vector<56xf32>
    %104 = vector.multi_reduction <add>, %103, %cst_51 [1] : vector<56x56xf32> to vector<56xf32>
    %105 = vector.shape_cast %104 : vector<56xf32> to vector<56x1xf32>
    %cst_52 = arith.constant 9.99999968E-21 : f32
    %106 = vector.broadcast %cst_52 : f32 to vector<56x1xf32>
    %107 = arith.maximumf %105, %106 : vector<56x1xf32>
    %108 = tpu.reciprocal %107 {approx = true} : vector<56x1xf32> -> vector<56x1xf32>
    %109 = vector.broadcast %108 : vector<56x1xf32> to vector<56x56xf32>
    %110 = arith.mulf %103, %109 : vector<56x56xf32>
    %cst_53 = arith.constant dense<0.000000e+00> : vector<56x128xf32>
    %111 = tpu.matmul %110, %78, %cst_53 {dimension_numbers = #tpu.dot_dimension_numbers<[1], [0], [0], [1], [0, 0, 1, 1], [], []>} : vector<56x56xf32>, vector<56x128xf32>, vector<56x128xf32> -> vector<56x128xf32>
    %112 = arith.addf %111, %81 : vector<56x128xf32>
    %cst_54 = arith.constant 0.000000e+00 : f32
    %113 = vector.broadcast %cst_54 : f32 to vector<56x128xf32>
    %114 = arith.cmpf ogt, %112, %113 : vector<56x128xf32>
    %cst_55 = arith.constant 0.00999999977 : f32
    %115 = vector.broadcast %cst_55 : f32 to vector<56x128xf32>
    %116 = arith.mulf %115, %112 : vector<56x128xf32>
    %117 = arith.select %114, %112, %116 : vector<56x128xi1>, vector<56x128xf32>
    %118 = vector.extract_strided_slice %117 {offsets = [24, 0], sizes = [32, 128], strides = [1, 1]} : vector<56x128xf32> to vector<32x128xf32>
    %c0_56 = arith.constant 0 : index
    %c640 = arith.constant 640 : index
    %119 = vector.load %arg3[%c0_56, %c640] : memref<128x1280xf32, #tpu.memory_space<vmem>>, vector<128x256xf32>
    %cst_57 = arith.constant dense<0.000000e+00> : vector<32x256xf32>
    %120 = tpu.matmul %118, %119, %cst_57 {dimension_numbers = #tpu.dot_dimension_numbers<[1], [0], [0], [1], [0, 0, 1, 1], [], []>} : vector<32x128xf32>, vector<128x256xf32>, vector<32x256xf32> -> vector<32x256xf32>
    %121 = tpu.iota {dimensions = array<i32: 0>} : vector<32x128xi32>
    %c16_i32 = arith.constant 16 : i32
    %122 = vector.broadcast %c16_i32 : i32 to vector<32x128xi32>
    %123 = arith.cmpi slt, %121, %122 : vector<32x128xi32>
    %124 = vector.extract_strided_slice %120 {offsets = [0, 0], sizes = [32, 128], strides = [1, 1]} : vector<32x256xf32> to vector<32x128xf32>
    %125 = vector.extract_strided_slice %120 {offsets = [0, 128], sizes = [32, 128], strides = [1, 1]} : vector<32x256xf32> to vector<32x128xf32>
    %126 = arith.select %123, %124, %125 : vector<32x128xi1>, vector<32x128xf32>
    %c0_58 = arith.constant 0 : index
    %c0_59 = arith.constant 0 : index
    %127 = vector.load %arg6[%c0_58, %c0_59] : memref<32x32xf32, #tpu.memory_space<vmem>>, vector<32x32xf32>
    %c176 = arith.constant 176 : index
    %c0_60 = arith.constant 0 : index
    %128 = vector.load %arg4[%c176, %c0_60] : memref<272x128xf32, #tpu.memory_space<vmem>>, vector<32x128xf32>
    %c208 = arith.constant 208 : index
    %c0_61 = arith.constant 0 : index
    %129 = vector.load %arg4[%c208, %c0_61] : memref<272x128xf32, #tpu.memory_space<vmem>>, vector<32x128xf32>
    %c240 = arith.constant 240 : index
    %c0_62 = arith.constant 0 : index
    %130 = vector.load %arg4[%c240, %c0_62] : memref<272x128xf32, #tpu.memory_space<vmem>>, vector<32x128xf32>
    %cst_63 = arith.constant dense<0.000000e+00> : vector<32x32xf32>
    %131 = tpu.matmul %128, %126, %cst_63 {dimension_numbers = #tpu.dot_dimension_numbers<[1], [1], [0], [0], [0, 0, 1, 0], [], []>} : vector<32x128xf32>, vector<32x128xf32>, vector<32x32xf32> -> vector<32x32xf32>
    %132 = arith.mulf %126, %129 : vector<32x128xf32>
    %cst_64 = arith.constant dense<0.000000e+00> : vector<32xf32>
    %133 = vector.multi_reduction <add>, %132, %cst_64 [1] : vector<32x128xf32> to vector<32xf32>
    %134 = vector.shape_cast %133 : vector<32xf32> to vector<32x1xf32>
    %135 = vector.broadcast %134 : vector<32x1xf32> to vector<32x32xf32>
    %136 = arith.addf %131, %135 : vector<32x32xf32>
    %cst_65 = arith.constant 0.000000e+00 : f32
    %137 = vector.broadcast %cst_65 : f32 to vector<32x32xf32>
    %138 = arith.cmpf ogt, %136, %137 : vector<32x32xf32>
    %cst_66 = arith.constant 2.000000e-01 : f32
    %139 = vector.broadcast %cst_66 : f32 to vector<32x32xf32>
    %140 = arith.mulf %139, %136 : vector<32x32xf32>
    %141 = arith.select %138, %136, %140 : vector<32x32xi1>, vector<32x32xf32>
    %cst_67 = arith.constant 0.000000e+00 : f32
    %142 = vector.broadcast %cst_67 : f32 to vector<32x32xf32>
    %143 = arith.cmpf ogt, %127, %142 : vector<32x32xf32>
    %cst_68 = arith.constant -1.000000e+30 : f32
    %144 = vector.broadcast %cst_68 : f32 to vector<32x32xf32>
    %145 = arith.select %143, %141, %144 : vector<32x32xi1>, vector<32x32xf32>
    %cst_69 = arith.constant dense<0xFF800000> : vector<32xf32>
    %146 = vector.multi_reduction <maximumf>, %145, %cst_69 [1] : vector<32x32xf32> to vector<32xf32>
    %147 = vector.shape_cast %146 : vector<32xf32> to vector<32x1xf32>
    %148 = vector.broadcast %147 : vector<32x1xf32> to vector<32x32xf32>
    %149 = arith.subf %145, %148 : vector<32x32xf32>
    %150 = math.exp %149 : vector<32x32xf32>
    %cst_70 = arith.constant 0.000000e+00 : f32
    %151 = vector.broadcast %cst_70 : f32 to vector<32x32xf32>
    %152 = arith.select %143, %150, %151 : vector<32x32xi1>, vector<32x32xf32>
    %cst_71 = arith.constant dense<0.000000e+00> : vector<32xf32>
    %153 = vector.multi_reduction <add>, %152, %cst_71 [1] : vector<32x32xf32> to vector<32xf32>
    %154 = vector.shape_cast %153 : vector<32xf32> to vector<32x1xf32>
    %cst_72 = arith.constant 9.99999968E-21 : f32
    %155 = vector.broadcast %cst_72 : f32 to vector<32x1xf32>
    %156 = arith.maximumf %154, %155 : vector<32x1xf32>
    %157 = tpu.reciprocal %156 {approx = true} : vector<32x1xf32> -> vector<32x1xf32>
    %158 = vector.broadcast %157 : vector<32x1xf32> to vector<32x32xf32>
    %159 = arith.mulf %152, %158 : vector<32x32xf32>
    %cst_73 = arith.constant dense<0.000000e+00> : vector<32x128xf32>
    %160 = tpu.matmul %159, %126, %cst_73 {dimension_numbers = #tpu.dot_dimension_numbers<[1], [0], [0], [1], [0, 0, 1, 1], [], []>} : vector<32x32xf32>, vector<32x128xf32>, vector<32x128xf32> -> vector<32x128xf32>
    %161 = arith.addf %160, %130 : vector<32x128xf32>
    %cst_74 = arith.constant 0.000000e+00 : f32
    %162 = vector.broadcast %cst_74 : f32 to vector<32x128xf32>
    %163 = arith.cmpf ogt, %161, %162 : vector<32x128xf32>
    %cst_75 = arith.constant 0.00999999977 : f32
    %164 = vector.broadcast %cst_75 : f32 to vector<32x128xf32>
    %165 = arith.mulf %164, %161 : vector<32x128xf32>
    %166 = arith.select %163, %161, %165 : vector<32x128xi1>, vector<32x128xf32>
    %167 = vector.extract_strided_slice %117 {offsets = [0, 0], sizes = [8, 128], strides = [1, 1]} : vector<56x128xf32> to vector<8x128xf32>
    %168 = vector.extract_strided_slice %117 {offsets = [8, 0], sizes = [8, 128], strides = [1, 1]} : vector<56x128xf32> to vector<8x128xf32>
    %169 = vector.extract_strided_slice %117 {offsets = [16, 0], sizes = [8, 128], strides = [1, 1]} : vector<56x128xf32> to vector<8x128xf32>
    %170 = vector.extract_strided_slice %166 {offsets = [0, 0], sizes = [8, 128], strides = [1, 1]} : vector<32x128xf32> to vector<8x128xf32>
    %171 = vector.extract_strided_slice %166 {offsets = [16, 0], sizes = [8, 128], strides = [1, 1]} : vector<32x128xf32> to vector<8x128xf32>
    %c0_76 = arith.constant 0 : index
    %c896 = arith.constant 896 : index
    %172 = vector.load %arg3[%c0_76, %c896] : memref<128x1280xf32, #tpu.memory_space<vmem>>, vector<128x128xf32>
    %cst_77 = arith.constant dense<0.000000e+00> : vector<8x128xf32>
    %173 = tpu.matmul %9, %172, %cst_77 {dimension_numbers = #tpu.dot_dimension_numbers<[1], [0], [0], [1], [0, 0, 1, 1], [], []>} : vector<8x128xf32>, vector<128x128xf32>, vector<8x128xf32> -> vector<8x128xf32>
    %c1 = arith.constant 1 : index
    %c0_78 = arith.constant 0 : index
    %174 = vector.load %arg4[%c1, %c0_78] : memref<272x128xf32, #tpu.memory_space<vmem>>, vector<1x128xf32>
    %175 = vector.broadcast %174 : vector<1x128xf32> to vector<8x128xf32>
    %176 = arith.addf %173, %175 : vector<8x128xf32>
    %177 = arith.mulf %168, %176 : vector<8x128xf32>
    %cst_79 = arith.constant dense<0.000000e+00> : vector<8xf32>
    %178 = vector.multi_reduction <add>, %177, %cst_79 [1] : vector<8x128xf32> to vector<8xf32>
    %179 = vector.shape_cast %178 : vector<8xf32> to vector<8x1xf32>
    %cst_80 = arith.constant 0.176776692 : f32
    %180 = vector.broadcast %cst_80 : f32 to vector<8x1xf32>
    %181 = arith.mulf %179, %180 : vector<8x1xf32>
    %182 = arith.mulf %169, %176 : vector<8x128xf32>
    %cst_81 = arith.constant dense<0.000000e+00> : vector<8xf32>
    %183 = vector.multi_reduction <add>, %182, %cst_81 [1] : vector<8x128xf32> to vector<8xf32>
    %184 = vector.shape_cast %183 : vector<8xf32> to vector<8x1xf32>
    %cst_82 = arith.constant 0.176776692 : f32
    %185 = vector.broadcast %cst_82 : f32 to vector<8x1xf32>
    %186 = arith.mulf %184, %185 : vector<8x1xf32>
    %187 = arith.mulf %170, %176 : vector<8x128xf32>
    %cst_83 = arith.constant dense<0.000000e+00> : vector<8xf32>
    %188 = vector.multi_reduction <add>, %187, %cst_83 [1] : vector<8x128xf32> to vector<8xf32>
    %189 = vector.shape_cast %188 : vector<8xf32> to vector<8x1xf32>
    %cst_84 = arith.constant 0.176776692 : f32
    %190 = vector.broadcast %cst_84 : f32 to vector<8x1xf32>
    %191 = arith.mulf %189, %190 : vector<8x1xf32>
    %192 = arith.mulf %171, %176 : vector<8x128xf32>
    %cst_85 = arith.constant dense<0.000000e+00> : vector<8xf32>
    %193 = vector.multi_reduction <add>, %192, %cst_85 [1] : vector<8x128xf32> to vector<8xf32>
    %194 = vector.shape_cast %193 : vector<8xf32> to vector<8x1xf32>
    %cst_86 = arith.constant 0.176776692 : f32
    %195 = vector.broadcast %cst_86 : f32 to vector<8x1xf32>
    %196 = arith.mulf %194, %195 : vector<8x1xf32>
    %197 = arith.mulf %167, %176 : vector<8x128xf32>
    %cst_87 = arith.constant dense<0.000000e+00> : vector<8xf32>
    %198 = vector.multi_reduction <add>, %197, %cst_87 [1] : vector<8x128xf32> to vector<8xf32>
    %199 = vector.shape_cast %198 : vector<8xf32> to vector<8x1xf32>
    %cst_88 = arith.constant 0.176776692 : f32
    %200 = vector.broadcast %cst_88 : f32 to vector<8x1xf32>
    %201 = arith.mulf %199, %200 : vector<8x1xf32>
    %202 = arith.maximumf %181, %186 : vector<8x1xf32>
    %203 = arith.maximumf %202, %191 : vector<8x1xf32>
    %204 = arith.maximumf %203, %196 : vector<8x1xf32>
    %205 = arith.maximumf %204, %201 : vector<8x1xf32>
    %206 = arith.subf %181, %205 : vector<8x1xf32>
    %207 = math.exp %206 : vector<8x1xf32>
    %208 = arith.subf %186, %205 : vector<8x1xf32>
    %209 = math.exp %208 : vector<8x1xf32>
    %210 = arith.subf %191, %205 : vector<8x1xf32>
    %211 = math.exp %210 : vector<8x1xf32>
    %212 = arith.subf %196, %205 : vector<8x1xf32>
    %213 = math.exp %212 : vector<8x1xf32>
    %214 = arith.subf %201, %205 : vector<8x1xf32>
    %215 = math.exp %214 : vector<8x1xf32>
    %216 = arith.addf %207, %209 : vector<8x1xf32>
    %217 = arith.addf %216, %211 : vector<8x1xf32>
    %218 = arith.addf %217, %213 : vector<8x1xf32>
    %219 = arith.addf %218, %215 : vector<8x1xf32>
    %220 = tpu.reciprocal %219 {approx = true} : vector<8x1xf32> -> vector<8x1xf32>
    %221 = arith.mulf %207, %220 : vector<8x1xf32>
    %222 = vector.broadcast %221 : vector<8x1xf32> to vector<8x128xf32>
    %223 = arith.mulf %222, %168 : vector<8x128xf32>
    %224 = arith.mulf %209, %220 : vector<8x1xf32>
    %225 = vector.broadcast %224 : vector<8x1xf32> to vector<8x128xf32>
    %226 = arith.mulf %225, %169 : vector<8x128xf32>
    %227 = arith.addf %223, %226 : vector<8x128xf32>
    %228 = arith.mulf %211, %220 : vector<8x1xf32>
    %229 = vector.broadcast %228 : vector<8x1xf32> to vector<8x128xf32>
    %230 = arith.mulf %229, %170 : vector<8x128xf32>
    %231 = arith.addf %227, %230 : vector<8x128xf32>
    %232 = arith.mulf %213, %220 : vector<8x1xf32>
    %233 = vector.broadcast %232 : vector<8x1xf32> to vector<8x128xf32>
    %234 = arith.mulf %233, %171 : vector<8x128xf32>
    %235 = arith.addf %231, %234 : vector<8x128xf32>
    %236 = arith.mulf %215, %220 : vector<8x1xf32>
    %237 = vector.broadcast %236 : vector<8x1xf32> to vector<8x128xf32>
    %238 = arith.mulf %237, %167 : vector<8x128xf32>
    %239 = arith.addf %235, %238 : vector<8x128xf32>
    %c0_89 = arith.constant 0 : index
    %c1024 = arith.constant 1024 : index
    %240 = vector.load %arg3[%c0_89, %c1024] : memref<128x1280xf32, #tpu.memory_space<vmem>>, vector<128x128xf32>
    %cst_90 = arith.constant dense<0.000000e+00> : vector<8x128xf32>
    %241 = tpu.matmul %9, %240, %cst_90 {dimension_numbers = #tpu.dot_dimension_numbers<[1], [0], [0], [1], [0, 0, 1, 1], [], []>} : vector<8x128xf32>, vector<128x128xf32>, vector<8x128xf32> -> vector<8x128xf32>
    %c0_91 = arith.constant 0 : index
    %c1152 = arith.constant 1152 : index
    %242 = vector.load %arg3[%c0_91, %c1152] : memref<128x1280xf32, #tpu.memory_space<vmem>>, vector<128x128xf32>
    %cst_92 = arith.constant dense<0.000000e+00> : vector<8x128xf32>
    %243 = tpu.matmul %239, %242, %cst_92 {dimension_numbers = #tpu.dot_dimension_numbers<[1], [0], [0], [1], [0, 0, 1, 1], [], []>} : vector<8x128xf32>, vector<128x128xf32>, vector<8x128xf32> -> vector<8x128xf32>
    %244 = arith.addf %241, %243 : vector<8x128xf32>
    %c2 = arith.constant 2 : index
    %c0_93 = arith.constant 0 : index
    %245 = vector.load %arg4[%c2, %c0_93] : memref<272x128xf32, #tpu.memory_space<vmem>>, vector<1x128xf32>
    %246 = vector.broadcast %245 : vector<1x128xf32> to vector<8x128xf32>
    %247 = arith.addf %244, %246 : vector<8x128xf32>
    %cst_94 = arith.constant dense<0xFF800000> : vector<8xf32>
    %248 = vector.multi_reduction <maximumf>, %247, %cst_94 [1] : vector<8x128xf32> to vector<8xf32>
    %249 = vector.shape_cast %248 : vector<8xf32> to vector<8x1xf32>
    %250 = vector.broadcast %249 : vector<8x1xf32> to vector<8x128xf32>
    %251 = arith.subf %247, %250 : vector<8x128xf32>
    %252 = math.exp %251 : vector<8x128xf32>
    %cst_95 = arith.constant dense<0.000000e+00> : vector<8xf32>
    %253 = vector.multi_reduction <add>, %252, %cst_95 [1] : vector<8x128xf32> to vector<8xf32>
    %254 = vector.shape_cast %253 : vector<8xf32> to vector<8x1xf32>
    %255 = math.log %254 : vector<8x1xf32>
    %256 = vector.broadcast %255 : vector<8x1xf32> to vector<8x128xf32>
    %257 = arith.subf %251, %256 : vector<8x128xf32>
    %c0_96 = arith.constant 0 : index
    %c0_97 = arith.constant 0 : index
    %258 = vector.load %arg7[%c0_96, %c0_97] : memref<8x128xf32, #tpu.memory_space<vmem>>, vector<8x128xf32>
    tpu.vector_store %arg7[%c0_96, %c0_97], %257 {strides = array<i32>} : memref<8x128xf32, #tpu.memory_space<vmem>>, vector<8x128xf32>,
    return
  }
}

</mosaic_0001>

<bundles_post_ra>
// kernel: merge_tamdur_forward.1
= control target key start
LH: loop header
LB: loop body
LE: loop exit
PB: predicated region body
PF: predicated region fallthrough
CT: control target
= control target key end

     0   :  { %12 = vsyncpa [#allocation4], 0  ;;  %s1665_s0 = inlined_call_operand.vmem [shape: f32[8,72], index: 0, kind: input, shape index: {}]   ;;  %s1666_s1 = inlined_call_operand.vmem [shape: f32[8,32], index: 1, kind: input, shape index: {}]   ;;  %s1667_s2 = inlined_call_operand.vmem [shape: f32[104,128], index: 2, kind: input, shape index: {}]   ;;  %s1668_s3 = inlined_call_operand.hbm [shape: f32[128,1280], index: 3, kind: input, shape index: {}]   ;;  %s1669_s4 = inlined_call_operand.hbm [shape: f32[272,128], index: 4, kind: input, shape index: {}]   ;;  %s1670_s5 = inlined_call_operand.vmem [shape: f32[56,56], index: 5, kind: input, shape index: {}]   ;;  %s1671_s6 = inlined_call_operand.hbm [shape: f32[32,32], index: 6, kind: input, shape index: {}]   ;;  %s1672_s7 = inlined_call_operand.vmem [shape: f32[8,128], index: 7, kind: output, shape index: {}]  }
   0x1   :  { %13 = vsyncpa [#allocation6], 0  ;;  %s37_s26 = sshll.u32 %s1669_s4, 4  ;;  %s1340_s27 = smov [#allocation5]   ;;  %s38_s26 = int_to_ptr.hbm [resolvable:$true] %s37_s26 }
   0x2   :  { %s39_s28 = sshll.u32 %s1340_s27, 4  ;;  %s24_s8 = sshll.u32 %s1668_s3, 4  ;;  %s40_s28 = int_to_ptr.vmem [resolvable:$true] %s39_s28  ;;  %s25_s8 = int_to_ptr.hbm [resolvable:$true] %s24_s8 }
   0x3   :  { %s1341_s9 = smov 128   ;;  %s1342_s10 = smov 8  }
   0x4   :  { %45 = dma.hbm_to_vmem [thread:$0]  %s38_s26, 4352, %s40_s28, [#allocation6], %s1341_s9, %s1341_s9, %s1342_s10  }
   0x5   :  { %s1343_s11 = smov [#allocation3]   ;;  %s1344_s13 = smov 1280  }
   0x6   :  { %s26_s12 = sshll.u32 %s1343_s11, 4  ;;  %s1345_s14 = smov 80   ;;  %s27_s12 = int_to_ptr.vmem [resolvable:$true] %s26_s12 }
   0x7   :  { %32 = dma.hbm_to_vmem [thread:$0]  %s25_s8, 20480, %s27_s12, [#allocation4], %s1344_s13, %s1344_s13, %s1345_s14  }
   0x8   :  { %s52_s16 = sshll.u32 %s1671_s6, 4  ;;  %s1346_s17 = smov [#allocation7]   ;;  %s53_s16 = int_to_ptr.hbm [resolvable:$true] %s52_s16 }
   0x9   :  { %s54_s18 = sshll.u32 %s1346_s17, 4  ;;  %s55_s18 = int_to_ptr.vmem [resolvable:$true] %s54_s18 }
   0xa   :  { %60 = dma.hbm_to_vmem [thread:$0]  %s53_s16, 512, %s55_s18, [#allocation6], %s1341_s9, %s1341_s9, %s1342_s10  }
   0xb   :  { %1336 = dma.done.wait [#allocation4], 20480  }
   0xc   :  { %1337 = vsyncadd [#allocation4], 4294946816 }
   0xd   :  { %1338 = dma.done.wait [#allocation6], 4864  }
   0xe   :  { %1339 = vsyncadd [#allocation6], 4294962432  ;;  %v82_v0 = vld [vmem:[%s1667_s2 + $0x40] sm:$0xff]  ;;  %v81_v1 = vld [vmem:[%s1667_s2 + $0x38] sm:$0xff]  ;;  %vm88_vm0 = vcmask 261120   ;;  %vm112_vm1 = vcmask 588800  }
   0xf   :  { %v87_v2 = vld [vmem:[%s1667_s2 + $0x60] sm:$0xff]  ;;  %123 = vmatpush.msra.mxu1 %v82_v0  ;;  %v86_v3 = vld [vmem:[%s1667_s2 + $0x58] sm:$0xff]  ;;  %v80_v4 = vld [vmem:[%s1667_s2 + $0x30] sm:$0xff]  ;;  %vm171_vm3 = vcmask 64512   ;;  %vm235_vm7 = vcmask 457728  }
  0x10   :  { %104 = vmatpush.msra.mxu2 %v87_v2  ;;  %v85_v5 = vld [vmem:[%s1667_s2 + $0x50] sm:$0xff]  ;;  %v79_v6 = vld [vmem:[%s1667_s2 + $0x28] sm:$0xff]  ;;  %v83_v8 = vld [vmem:[%s1666_s1] sm:$0xff] }
  0x11   :  { %124 = vmatpush.msra.mxu1 %v81_v1  ;;  %v84_v7 = vld [vmem:[%s1667_s2 + $0x48] sm:$0xff]  ;;  %v321_v10 = vld [vmem:[#allocation3 + $0x460] sm:$0xff]  ;;  %v78_v11 = vld [vmem:[%s1667_s2 + $0x20] sm:$0xff] }
  0x12   :  { %105 = vmatpush.msra.mxu2 %v86_v3  ;;  %v326_v9 = vld [vmem:[#allocation3 + $0x4b0] sm:$0xff]  ;;  %v77_v13 = vld [vmem:[%s1667_s2 + $0x18] sm:$0xff]  ;;  %v76_v16 = vld [vmem:[%s1667_s2 + $0x10] sm:$0xff] }
  0x13   :  { %125 = vmatpush.msra.mxu1 %v80_v4  ;;  %331 = vmatpush.msra.mxu3 %v326_v9  ;;  %v316_v12 = vld [vmem:[#allocation3 + $0x410] sm:$0xff]  ;;  %v311_v14 = vld [vmem:[#allocation3 + $0x3c0] sm:$0xff]  ;;  %v74_v23 = vld [vmem:[%s1667_s2] sm:$0xff] }
  0x14   :  { %106 = vmatpush.msra.mxu2 %v85_v5  ;;  %v328_v15 = vld [vmem:[#allocation3 + $0x4c0] sm:$0xff]  ;;  %v323_v17 = vld [vmem:[#allocation3 + $0x470] sm:$0xff]  ;;  %v73_v24 = vld [vmem:[%s1665_s0] sm:$0xff] }
  0x15   :  { %126 = vmatpush.msra.mxu1 %v79_v6  ;;  %332 = vmatpush.msra.mxu3 %v321_v10  ;;  %v306_v18 = vld [vmem:[#allocation3 + $0x370] sm:$0xff]  ;;  %v318_v19 = vld [vmem:[#allocation3 + $0x420] sm:$0xff]  ;;  %v329_v26 = vld [vmem:[#allocation3 + $0x4c8] sm:$0xff] }
  0x16   :  { %107 = vmatpush.msra.mxu2 %v84_v7  ;;  %371 = vmatpush.msra.mxu0 %v328_v15  ;;  %v75_v20 = vld [vmem:[%s1667_s2 + $0x8] sm:$0xff]  ;;  %v301_v21 = vld [vmem:[#allocation3 + $0x320] sm:$0xff]  ;;  %v324_v29 = vld [vmem:[#allocation3 + $0x478] sm:$0xff]  ;;  %v139_v15 = vlaneseq }
  0x17   :  { %1178 = vmatmul.msk.f32.vlgmr.msra.gmra.mxu2 %vm88_vm0, %v83_v8  ;;  %127 = vmatpush.msra.mxu1 %v78_v11  ;;  %v313_v22 = vld [vmem:[#allocation3 + $0x3d0] sm:$0xff]  ;;  %v308_v27 = vld [vmem:[#allocation3 + $0x380] sm:$0xff]  ;;  %v319_v32 = vld [vmem:[#allocation3 + $0x428] sm:$0xff] }
  0x18   :  { %333 = vmatpush.msra.mxu3 %v316_v12  ;;  %372 = vmatpush.msra.mxu0 %v323_v17  ;;  %v296_v25 = vld [vmem:[#allocation3 + $0x2d0] sm:$0xff]  ;;  %v291_v28 = vld [vmem:[#allocation3 + $0x280] sm:$0xff]  ;;  %v314_v35 = vld [vmem:[#allocation3 + $0x3d8] sm:$0xff]  ;;  %v140_v17 = vand.u32 127, %v139_v15 }
  0x19   :  { %128 = vmatpush.msra.mxu1 %v77_v13  ;;  %v303_v30 = vld [vmem:[#allocation3 + $0x330] sm:$0xff]  ;;  %v298_v33 = vld [vmem:[#allocation3 + $0x2e0] sm:$0xff]  ;;  %v309_v38 = vld [vmem:[#allocation3 + $0x388] sm:$0xff] }
  0x1a   :  { %334 = vmatpush.msra.mxu3 %v311_v14  ;;  %373 = vmatpush.msra.mxu0 %v318_v19  ;;  %v286_v31 = vld [vmem:[#allocation3 + $0x230] sm:$0xff]  ;;  %v281_v34 = vld [vmem:[#allocation3 + $0x1e0] sm:$0xff]  ;;  %v304_v41 = vld [vmem:[#allocation3 + $0x338] sm:$0xff]  ;;  %vm141_vm2 = vcmp.lt.s32.totalorder %v140_v17, 96 }
  0x1b   :  { %129 = vmatpush.msra.mxu1 %v76_v16  ;;  %v293_v36 = vld [vmem:[#allocation3 + $0x290] sm:$0xff]  ;;  %v288_v39 = vld [vmem:[#allocation3 + $0x240] sm:$0xff]  ;;  %v299_v44 = vld [vmem:[#allocation3 + $0x2e8] sm:$0xff] }
  0x1c   :  { %335 = vmatpush.msra.mxu3 %v306_v18  ;;  %374 = vmatpush.msra.mxu0 %v313_v22  ;;  %v276_v37 = vld [vmem:[#allocation3 + $0x190] sm:$0xff]  ;;  %v271_v40 = vld [vmem:[#allocation3 + $0x140] sm:$0xff]  ;;  %v294_v47 = vld [vmem:[#allocation3 + $0x298] sm:$0xff] }
  0x1d   :  { %130 = vmatpush.msra.mxu1 %v75_v20  ;;  %v283_v42 = vld [vmem:[#allocation3 + $0x1f0] sm:$0xff]  ;;  %v278_v45 = vld [vmem:[#allocation3 + $0x1a0] sm:$0xff]  ;;  %v289_v50 = vld [vmem:[#allocation3 + $0x248] sm:$0xff] }
  0x1e   :  { %336 = vmatpush.msra.mxu3 %v301_v21  ;;  %375 = vmatpush.msra.mxu0 %v308_v27  ;;  %v266_v43 = vld [vmem:[#allocation3 + $0xf0] sm:$0xff]  ;;  %v261_v46 = vld [vmem:[#allocation3 + $0xa0] sm:$0xff]  ;;  %v284_v54 = vld [vmem:[#allocation3 + $0x1f8] sm:$0xff] }
  0x1f   :  { %131 = vmatpush.msra.mxu1 %v74_v23  ;;  %v273_v48 = vld [vmem:[#allocation3 + $0x150] sm:$0xff]  ;;  %v268_v51 = vld [vmem:[#allocation3 + $0x100] sm:$0xff]  ;;  %v279_v56 = vld [vmem:[#allocation3 + $0x1a8] sm:$0xff] }
  0x20   :  { %1179 = vmatmul.msk.f32.vlgmr.msra.gmra.mxu1 %vm112_vm1, %v73_v24  ;;  %337 = vmatpush.msra.mxu3 %v296_v25  ;;  %v256_v49 = vld [vmem:[#allocation3 + $0x50] sm:$0xff]  ;;  %v251_v52 = vld [vmem:[#allocation3] sm:$0xff]  ;;  %v274_v58 = vld [vmem:[#allocation3 + $0x158] sm:$0xff] }
  0x21   :  { %391 = vmatpush.msrb.mxu1 %v329_v26  ;;  %376 = vmatpush.msra.mxu0 %v303_v30  ;;  %v330_v53 = vld [vmem:[#allocation3 + $0x4d0] sm:$0xff]  ;;  %v325_v55 = vld [vmem:[#allocation3 + $0x480] sm:$0xff]  ;;  %v269_v60 = vld [vmem:[#allocation3 + $0x108] sm:$0xff] }
  0x22   :  { %338 = vmatpush.msra.mxu3 %v291_v28  ;;  %v320_v57 = vld [vmem:[#allocation3 + $0x430] sm:$0xff]  ;;  %v315_v59 = vld [vmem:[#allocation3 + $0x3e0] sm:$0xff]  ;;  %v264_v3 = vld [vmem:[#allocation3 + $0xb8] sm:$0xff] }
  0x23   :  { %392 = vmatpush.msrb.mxu1 %v324_v29  ;;  %377 = vmatpush.msra.mxu0 %v298_v33  ;;  %v310_v61 = vld [vmem:[#allocation3 + $0x390] sm:$0xff]  ;;  %v305_v62 = vld [vmem:[#allocation3 + $0x340] sm:$0xff]  ;;  %v259_v6 = vld [vmem:[#allocation3 + $0x68] sm:$0xff] }
  0x24   :  { %339 = vmatpush.msra.mxu3 %v286_v31  ;;  %v300_v63 = vld [vmem:[#allocation3 + $0x2f0] sm:$0xff]  ;;  %v295_v0 = vld [vmem:[#allocation3 + $0x2a0] sm:$0xff]  ;;  %v254_v9 = vld [vmem:[#allocation3 + $0x18] sm:$0xff] }
  0x25   :  { %393 = vmatpush.msrb.mxu1 %v319_v32  ;;  %378 = vmatpush.msra.mxu0 %v293_v36  ;;  %v290_v1 = vld [vmem:[#allocation3 + $0x250] sm:$0xff]  ;;  %v285_v4 = vld [vmem:[#allocation3 + $0x200] sm:$0xff]  ;;  %v327_v22 = vld [vmem:[#allocation3 + $0x4b8] sm:$0xff] }
  0x26   :  { %340 = vmatpush.msra.mxu3 %v281_v34  ;;  %v263_v2 = vld [vmem:[#allocation3 + $0xb0] sm:$0xff]  ;;  %v258_v5 = vld [vmem:[#allocation3 + $0x60] sm:$0xff]  ;;  %v322_v24 = vld [vmem:[#allocation3 + $0x468] sm:$0xff] }
  0x27   :  { %394 = vmatpush.msrb.mxu1 %v314_v35  ;;  %379 = vmatpush.msra.mxu0 %v288_v39  ;;  %v280_v7 = vld [vmem:[#allocation3 + $0x1b0] sm:$0xff]  ;;  %v275_v10 = vld [vmem:[#allocation3 + $0x160] sm:$0xff]  ;;  %v317_v26 = vld [vmem:[#allocation3 + $0x418] sm:$0xff] }
  0x28   :  { %341 = vmatpush.msra.mxu3 %v276_v37  ;;  %v253_v8 = vld [vmem:[#allocation3 + $0x10] sm:$0xff]  ;;  %v265_v12 = vld [vmem:[#allocation3 + $0xc0] sm:$0xff]  ;;  %v312_v27 = vld [vmem:[#allocation3 + $0x3c8] sm:$0xff] }
  0x29   :  { %395 = vmatpush.msrb.mxu1 %v309_v38  ;;  %380 = vmatpush.msra.mxu0 %v283_v42  ;;  %v270_v11 = vld [vmem:[#allocation3 + $0x110] sm:$0xff]  ;;  %v255_v14 = vld [vmem:[#allocation3 + $0x20] sm:$0xff]  ;;  %v307_v28 = vld [vmem:[#allocation3 + $0x378] sm:$0xff] }
  0x2a   :  { %342 = vmatpush.msra.mxu3 %v271_v40  ;;  %v260_v13 = vld [vmem:[#allocation3 + $0x70] sm:$0xff]  ;;  %v1201_v18 = vld [vmem:[#allocation5] ss:$0 sm:$0xff]  ;;  %v302_v29 = vld [vmem:[#allocation3 + $0x328] sm:$0xff] }
  0x2b   :  { %396 = vmatpush.msrb.mxu1 %v304_v41  ;;  %381 = vmatpush.msra.mxu0 %v278_v45  ;;  %v297_v30 = vld [vmem:[#allocation3 + $0x2d8] sm:$0xff]  ;;  %v292_v31 = vld [vmem:[#allocation3 + $0x288] sm:$0xff] }
  0x2c   :  { %343 = vmatpush.msra.mxu3 %v266_v43  ;;  %v287_v32 = vld [vmem:[#allocation3 + $0x238] sm:$0xff]  ;;  %v282_v33 = vld [vmem:[#allocation3 + $0x1e8] sm:$0xff]  ;;  %v438_v43 = vld [vmem:[#allocation5 + $0x40] sm:$0xff] }
  0x2d   :  { %397 = vmatpush.msrb.mxu1 %v299_v44  ;;  %382 = vmatpush.msra.mxu0 %v273_v48  ;;  %v277_v34 = vld [vmem:[#allocation3 + $0x198] sm:$0xff]  ;;  %v272_v35 = vld [vmem:[#allocation3 + $0x148] sm:$0xff] }
  0x2e   :  { %344 = vmatpush.msra.mxu3 %v261_v46  ;;  %v267_v36 = vld [vmem:[#allocation3 + $0xf8] sm:$0xff]  ;;  %v262_v37 = vld [vmem:[#allocation3 + $0xa8] sm:$0xff] }
  0x2f   :  { %398 = vmatpush.msrb.mxu1 %v294_v47  ;;  %383 = vmatpush.msra.mxu0 %v268_v51  ;;  %v257_v38 = vld [vmem:[#allocation3 + $0x58] sm:$0xff]  ;;  %v252_v39 = vld [vmem:[#allocation3 + $0x8] sm:$0xff] }
  0x30   :  { %345 = vmatpush.msra.mxu3 %v256_v49  ;;  %v441_v40 = vld [vmem:[#allocation5 + $0x58] sm:$0xff] }
  0x31   :  { %399 = vmatpush.msrb.mxu1 %v289_v50  ;;  %384 = vmatpush.msra.mxu0 %v263_v2  ;;  %v443_v50 = vld [vmem:[#allocation5 + $0x68] sm:$0xff]  ;;  %v1004_v17 = vld [vmem:[#allocation3 + $0x498] sm:$0xff] }
  0x32   :  { %346 = vmatpush.msra.mxu3 %v251_v52 }
  0x33   :  { %400 = vmatpush.msrb.mxu1 %v284_v54  ;;  %385 = vmatpush.msra.mxu0 %v258_v5 }
  0x34   :  { %411 = vmatpush.msrb.mxu3 %v330_v53 }
  0x35   :  { %401 = vmatpush.msrb.mxu1 %v279_v56  ;;  %386 = vmatpush.msra.mxu0 %v253_v8  ;;  %v1347_v56 = vmov 0.0  }
  0x36   :  { %412 = vmatpush.msrb.mxu3 %v325_v55 }
  0x37   :  { %402 = vmatpush.msrb.mxu1 %v274_v58  ;;  %v169_v58 = vshrl.u32 %v139_v15, 7 }
  0x38   :  { %413 = vmatpush.msrb.mxu3 %v320_v57 }
  0x39   :  { %403 = vmatpush.msrb.mxu1 %v269_v60 }
  0x3a   :  { %414 = vmatpush.msrb.mxu3 %v315_v59 }
  0x3b   :  { %404 = vmatpush.msrb.mxu1 %v264_v3 }
  0x3c   :  { %415 = vmatpush.msrb.mxu3 %v310_v61 }
  0x3d   :  { %405 = vmatpush.msrb.mxu1 %v259_v6  ;;  %v439_v6 = vld [vmem:[#allocation5 + $0x48] sm:$0xff] }
  0x3e   :  { %416 = vmatpush.msrb.mxu3 %v305_v62  ;;  %v1458_v62 = vcvt.s32.f32 %v169_v58 }
  0x3f   :  { %406 = vmatpush.msrb.mxu1 %v254_v9 }
  0x40   :  { %417 = vmatpush.msrb.mxu3 %v300_v63 }
  0x42   :  { %418 = vmatpush.msrb.mxu3 %v295_v0 }
  0x44   :  { %419 = vmatpush.msrb.mxu3 %v290_v1 }
  0x46   :  { %420 = vmatpush.msrb.mxu3 %v285_v4 }
  0x48   :  { %421 = vmatpush.msrb.mxu3 %v280_v7 }
  0x4a   :  { %422 = vmatpush.msrb.mxu3 %v275_v10 }
  0x4c   :  { %423 = vmatpush.msrb.mxu3 %v270_v11  ;;  %v1005_v11 = vld [vmem:[#allocation3 + $0x4e8] sm:$0xff] }
  0x4e   :  { %424 = vmatpush.msrb.mxu3 %v265_v12 }
  0x50   :  { %425 = vmatpush.msrb.mxu3 %v260_v13 }
  0x52   :  { %426 = vmatpush.msrb.mxu3 %v255_v14  ;;  %v431_v14 = vld [vmem:[#allocation5 + $0x8] sm:$0xff] }
  0x9a   :  { %v109_v16 = vpop.f32.mrf.mxu2 }
  0x9d   :  { %v133_v19 = vpop.f32.mrf.mxu1 }
  0x9e   :  { %v134_v20 = vadd.f32 %v133_v19, %v109_v16  ;;  %v440_v16 = vld [vmem:[#allocation5 + $0x50] sm:$0xff]  ;;  %v1003_v19 = vld [vmem:[#allocation3 + $0x448] sm:$0xff] }
  0xa0   :  { %v1444_v21 = vadd.f32 %v1201_v18, %v134_v20 }
  0xa2   :  { %1180 = vmatpush.xpose.msk.msrb.mxu2 %vm141_vm2, %v1444_v21  ;;  %347 = vmatmul.f32.vlgmr.msra.gmra.mxu3 %v1444_v21  ;;  %v142_v23 = vsel %vm141_vm2, %v1444_v21, 0.0 }
  0xa3   :  { %387 = vmatmul.f32.vlgmr.msra.gmra.mxu0 %v1444_v21  ;;  %407 = vmatmul.f32.vlgmr.msrb.gmra.mxu1 %v1444_v21  ;;  %v143_v25 = vmul.f32 %v142_v23, %v142_v23  ;;  %v1002_v23 = vld [vmem:[#allocation3 + $0x3f8] sm:$0xff] }
  0xa5   :  { %1181 = vmatmul.msk.f32.vlgmr.msrb.gmra.mxu2 %vm141_vm2, %v1444_v21  ;;  %144 = vadd.xlane.f32.xlu0 %v143_v25  ;;  %v1001_v25 = vld [vmem:[#allocation3 + $0x3a8] sm:$0xff] }
  0xa6   :  { %351 = vmatpush.msra.mxu2 %v327_v22 }
  0xa8   :  { %352 = vmatpush.msra.mxu2 %v322_v24 }
  0xaa   :  { %353 = vmatpush.msra.mxu2 %v317_v26  ;;  %427 = vmatmul.f32.vlgmr.msrb.gmra.mxu3 %v1444_v21  ;;  %v432_v26 = vld [vmem:[#allocation5 + $0x10] sm:$0xff] }
  0xac   :  { %354 = vmatpush.msra.mxu2 %v312_v27 }
  0xae   :  { %355 = vmatpush.msra.mxu2 %v307_v28  ;;  %v1000_v28 = vld [vmem:[#allocation3 + $0x358] sm:$0xff] }
  0xb0   :  { %356 = vmatpush.msra.mxu2 %v302_v29 }
  0xb2   :  { %357 = vmatpush.msra.mxu2 %v297_v30  ;;  %v999_v30 = vld [vmem:[#allocation3 + $0x308] sm:$0xff] }
  0xb4   :  { %358 = vmatpush.msra.mxu2 %v292_v31  ;;  %v998_v31 = vld [vmem:[#allocation3 + $0x2b8] sm:$0xff] }
  0xb6   :  { %359 = vmatpush.msra.mxu2 %v287_v32 }
  0xb8   :  { %360 = vmatpush.msra.mxu2 %v282_v33 }
  0xba   :  { %361 = vmatpush.msra.mxu2 %v277_v34  ;;  %v997_v34 = vld [vmem:[#allocation3 + $0x268] sm:$0xff] }
  0xbc   :  { %362 = vmatpush.msra.mxu2 %v272_v35 }
  0xbe   :  { %363 = vmatpush.msra.mxu2 %v267_v36  ;;  %v433_v36 = vld [vmem:[#allocation5 + $0x18] sm:$0xff] }
  0xc0   :  { %364 = vmatpush.msra.mxu2 %v262_v37  ;;  %v442_v37 = vld [vmem:[#allocation5 + $0x60] sm:$0xff] }
  0xc2   :  { %365 = vmatpush.msra.mxu2 %v257_v38  ;;  %v996_v38 = vld [vmem:[#allocation3 + $0x218] sm:$0xff] }
  0xc4   :  { %366 = vmatpush.msra.mxu2 %v252_v39  ;;  %v456_v39 = vmul.f32 0.0, %v442_v37 }
  0xc5   :  { %367 = vmatmul.f32.vlgmr.msra.gmra.mxu2 %v1444_v21 }
 0x118   :  { %v145_v48 = vpop.xlane.xlu0 %144 }
 0x120   :  { %v408_v41 = vpop.f32.mrf.mxu1  ;;  %v388_v59 = vpop.f32.mrf.mxu0 }
 0x121   :  { %v455_v42 = vmul.f32 %v441_v40, %v408_v41  ;;  %v454_v20 = vmul.f32 %v440_v16, %v388_v59  ;;  %v229_v16 = vld [vmem:[%s1670_s5 + $0x8] sm:$0xff] }
 0x122   :  { %237 = vst.msk [vmem:[#allocation2 + $0x8] sm:$0xff] %vm235_vm7, %v229_v16 }
 0x123   :  { %465 = vadd.xlane.f32.xlu2 %v455_v42 }
 0x125   :  { %v348_v44 = vpop.f32.mrf.mxu3 }
 0x126   :  { %v452_v45 = vmul.f32 %v438_v43, %v348_v44  ;;  %v994_v43 = vld [vmem:[#allocation3 + $0x178] sm:$0xff] }
 0x128   :  { %v163_v46 = vpop.f32.mrf.mxu2  ;;  %459 = vadd.xlane.f32.xlu0 %v452_v45  ;;  %v993_v45 = vld [vmem:[#allocation3 + $0x128] sm:$0xff] }
 0x129   :  { %v166_v47 = vmul.f32 2.0, %v163_v46 }
 0x12b   :  { %v167_v49 = vsub.f32 %v145_v48, %v166_v47  ;;  %467 = vadd.xlane.f32.xlu2 %v456_v39  ;;  %v434_v47 = vld [vmem:[#allocation5 + $0x20] sm:$0xff]  ;;  %v992_v48 = vld [vmem:[#allocation3 + $0xd8] sm:$0xff] }
 0x12d   :  { %v172_v51 = vsel %vm171_vm3, %v167_v49, inf  ;;  %v428_v52 = vpop.f32.mrf.mxu3 }
 0x12e   :  { %v173_v53 = vrot.slane %v172_v51, 4  ;;  %483 = vmatpush.xpose.msrb.mxu2 %v428_v52  ;;  %668 = vmatpush.msrb.mxu0 %v428_v52  ;;  %v457_v54 = vmul.f32 %v443_v50, %v428_v52  ;;  %v228_v50 = vld [vmem:[%s1670_s5] sm:$0xff]  ;;  %v444_v52 = vld [vmem:[#allocation5 + $0x70] sm:$0xff] }
 0x12f   :  { %236 = vst.msk [vmem:[#allocation2] sm:$0xff] %vm235_vm7, %v228_v50 }
 0x130   :  { %v174_v55 = vmin.f32 %v172_v51, %v173_v53  ;;  %669 = vmatpush.msrb.mxu0 %v1347_v56  ;;  %469 = vadd.xlane.f32.xlu0 %v457_v54  ;;  %v991_v51 = vld [vmem:[#allocation3 + $0x88] sm:$0xff]  ;;  %v990_v54 = vld [vmem:[#allocation3 + $0x38] sm:$0xff] }
 0x132   :  { %v175_v57 = vrot.slane %v174_v55, 2  ;;  %484 = vmatpush.xpose.msrb.mxu2 %v1347_v56  ;;  %670 = vmatpush.msrb.mxu0 %v408_v41 }
 0x134   :  { %v176_v60 = vmin.f32 %v174_v55, %v175_v57  ;;  %671 = vmatpush.msrb.mxu0 %v388_v59  ;;  %v458_v55 = vmul.f32 0.0, %v444_v52 }
 0x136   :  { %v177_v61 = vrot.slane %v176_v60, 1  ;;  %485 = vmatpush.xpose.msrb.mxu2 %v408_v41  ;;  %v995_v41 = vld [vmem:[#allocation3 + $0x1c8] sm:$0xff]  ;;  %471 = vadd.xlane.f32.xlu2 %v458_v55 }
 0x138   :  { %v178_v63 = vmin.f32 %v176_v60, %v177_v61 }
 0x13a   :  { %vm179_vm4 = vcmp.le.f32.partialorder %v167_v49, %v178_v63  ;;  %486 = vmatpush.xpose.msrb.mxu2 %v388_v59  ;;  %v435_v59 = vld [vmem:[#allocation5 + $0x28] sm:$0xff] }
 0x13b   :  { %v180_v0 = vsel %vm179_vm4, %v1458_v62, 8.0 }
 0x13c   :  { %v181_v1 = vsel %vm171_vm3, %v180_v0, inf }
 0x13d   :  { %v182_v2 = vrot.slane %v181_v1, 4 }
 0x13f   :  { %v183_v3 = vmin.f32 %v181_v1, %v182_v2  ;;  %v436_v1 = vld [vmem:[#allocation5 + $0x30] sm:$0xff] }
 0x141   :  { %v184_v4 = vrot.slane %v183_v3, 2 }
 0x143   :  { %v185_v5 = vmin.f32 %v183_v3, %v184_v4 }
 0x145   :  { %v186_v7 = vrot.slane %v185_v5, 1 }
 0x147   :  { %v1462_v9 = vmin.f32 %v185_v5, %v186_v7  ;;  %v437_v7 = vld [vmem:[#allocation5 + $0x38] sm:$0xff] }
 0x148   :  { %v368_v8 = vpop.f32.mrf.mxu2 }
 0x149   :  { %487 = vmatpush.xpose.msrb.mxu2 %v368_v8  ;;  %672 = vmatpush.msrb.mxu0 %v368_v8  ;;  %v453_v10 = vmul.f32 %v439_v6, %v368_v8  ;;  %vm188_vm5 = vcmp.eq.f32.partialorder %v1458_v62, %v1462_v9  ;;  %v232_v9 = vld [vmem:[%s1670_s5 + $0x20] sm:$0xff] }
 0x14a   :  { %v1469_v12 = vsel %vm188_vm5, 1e+30, %v167_v49  ;;  %240 = vst.msk [vmem:[#allocation2 + $0x20] sm:$0xff] %vm235_vm7, %v232_v9 }
 0x14b   :  { %673 = vmatpush.msrb.mxu0 %v348_v44  ;;  %461 = vadd.xlane.f32.xlu1 %v453_v10  ;;  %v191_v13 = vsel %vm171_vm3, %v1469_v12, inf }
 0x14c   :  { %v192_v15 = vrot.slane %v191_v13, 4 }
 0x14d   :  { %488 = vmatpush.xpose.msrb.mxu2 %v348_v44 }
 0x14e   :  { %v193_v18 = vmin.f32 %v191_v13, %v192_v15  ;;  %v189_v13 = vsel %vm188_vm5, 1.0, %v1347_v56  ;;  %v230_v56 = vld [vmem:[%s1670_s5 + $0x10] sm:$0xff] }
 0x14f   :  { %238 = vst.msk [vmem:[#allocation2 + $0x10] sm:$0xff] %vm235_vm7, %v230_v56 }
 0x150   :  { %489 = vmatmul.f32.vlgmr.msrb.gmra.mxu2 %v431_v14  ;;  %v194_v22 = vrot.slane %v193_v18, 2 }
 0x151   :  { %1008 = vmatpush.msra.mxu2 %v1005_v11 }
 0x152   :  { %v195_v24 = vmin.f32 %v193_v18, %v194_v22 }
 0x153   :  { %1009 = vmatpush.msra.mxu2 %v1004_v17  ;;  %463 = vadd.xlane.f32.xlu1 %v454_v20 }
 0x154   :  { %v196_v27 = vrot.slane %v195_v24, 1 }
 0x155   :  { %1010 = vmatpush.msra.mxu2 %v1003_v19 }
 0x156   :  { %v197_v29 = vmin.f32 %v195_v24, %v196_v27 }
 0x157   :  { %1011 = vmatpush.msra.mxu2 %v1002_v23  ;;  %v233_v23 = vld [vmem:[%s1670_s5 + $0x28] sm:$0xff] }
 0x158   :  { %492 = vmatmul.f32.gmra.mxu2 %v432_v26  ;;  %vm198_vm6 = vcmp.le.f32.partialorder %v1469_v12, %v197_v29  ;;  %241 = vst.msk [vmem:[#allocation2 + $0x28] sm:$0xff] %vm235_vm7, %v233_v23  ;;  %v1525_v29 = vld [vmem:[#allocation2 + $0x8] sm:$0xff] }
 0x159   :  { %1012 = vmatpush.msra.mxu2 %v1001_v25  ;;  %v199_v32 = vsel %vm198_vm6, %v1458_v62, 8.0  ;;  %vm533_vm14 = vcmp.gt.f32.partialorder %v1525_v29, 0.0 }
 0x15a   :  { %v200_v33 = vsel %vm171_vm3, %v199_v32, inf  ;;  %v234_v32 = vld [vmem:[%s1670_s5 + $0x30] sm:$0xff] }
 0x15b   :  { %1013 = vmatpush.msra.mxu2 %v1000_v28  ;;  %v201_v35 = vrot.slane %v200_v33, 4  ;;  %242 = vst.msk [vmem:[#allocation2 + $0x30] sm:$0xff] %vm235_vm7, %v234_v32 }
 0x15d   :  { %1014 = vmatpush.msra.mxu2 %v999_v30  ;;  %v202_v40 = vmin.f32 %v200_v33, %v201_v35 }
 0x15f   :  { %1015 = vmatpush.msra.mxu2 %v998_v31  ;;  %v203_v42 = vrot.slane %v202_v40, 2 }
 0x160   :  { %495 = vmatmul.f32.gmra.mxu2 %v433_v36 }
 0x161   :  { %1016 = vmatpush.msra.mxu2 %v997_v34  ;;  %v204_v44 = vmin.f32 %v202_v40, %v203_v42 }
 0x163   :  { %1017 = vmatpush.msra.mxu2 %v996_v38  ;;  %v205_v46 = vrot.slane %v204_v44, 1  ;;  %v1538_v38 = vld [vmem:[#allocation2 + $0x10] sm:$0xff] }
 0x164   :  { %vm534_vm1 = vcmp.gt.f32.partialorder %v1538_v38, 0.0 }
 0x165   :  { %1018 = vmatpush.msra.mxu2 %v995_v41  ;;  %v206_v49 = vmin.f32 %v204_v44, %v205_v46 }
 0x167   :  { %1019 = vmatpush.msra.mxu2 %v994_v43  ;;  %vm207_vm8 = vcmp.eq.f32.partialorder %v1458_v62, %v206_v49 }
 0x168   :  { %498 = vmatmul.f32.gmra.mxu2 %v434_v47  ;;  %v209_v53 = vsel %vm207_vm8, 1e+30, %v1469_v12  ;;  %v208_v14 = vsel %vm207_vm8, 1.0, %v189_v13 }
 0x169   :  { %1020 = vmatpush.msra.mxu2 %v993_v45  ;;  %v210_v57 = vsel %vm171_vm3, %v209_v53, inf }
 0x16a   :  { %v211_v58 = vrot.slane %v210_v57, 4 }
 0x16b   :  { %1021 = vmatpush.msra.mxu2 %v992_v48 }
 0x16c   :  { %v212_v60 = vmin.f32 %v210_v57, %v211_v58 }
 0x16d   :  { %1022 = vmatpush.msra.mxu2 %v991_v51 }
 0x16e   :  { %v213_v61 = vrot.slane %v212_v60, 2 }
 0x16f   :  { %1023 = vmatpush.msra.mxu2 %v990_v54  ;;  %v1550_v54 = vld [vmem:[#allocation2 + $0x20] sm:$0xff] }
 0x170   :  { %501 = vmatmul.f32.gmra.mxu2 %v435_v59  ;;  %v214_v63 = vmin.f32 %v212_v60, %v213_v61  ;;  %vm536_vm5 = vcmp.gt.f32.partialorder %v1550_v54, 0.0 }
 0x172   :  { %v215_v0 = vrot.slane %v214_v63, 1 }
 0x174   :  { %v216_v2 = vmin.f32 %v214_v63, %v215_v0  ;;  %v1556_v0 = vld [vmem:[#allocation2 + $0x28] sm:$0xff] }
 0x175   :  { %vm537_vm8 = vcmp.gt.f32.partialorder %v1556_v0, 0.0 }
 0x176   :  { %vm217_vm9 = vcmp.le.f32.partialorder %v209_v53, %v216_v2 }
 0x177   :  { %v218_v3 = vsel %vm217_vm9, %v1458_v62, 8.0 }
 0x178   :  { %504 = vmatmul.f32.gmra.mxu2 %v436_v1  ;;  %v219_v4 = vsel %vm171_vm3, %v218_v3, inf }
 0x179   :  { %v220_v5 = vrot.slane %v219_v4, 4 }
 0x17b   :  { %v221_v6 = vmin.f32 %v219_v4, %v220_v5 }
 0x17d   :  { %v222_v8 = vrot.slane %v221_v6, 2 }
 0x17f   :  { %v223_v10 = vmin.f32 %v221_v6, %v222_v8  ;;  %v1562_v8 = vld [vmem:[#allocation2 + $0x30] sm:$0xff] }
 0x180   :  { %507 = vmatmul.f32.gmra.mxu2 %v437_v7 }
 0x181   :  { %v224_v11 = vrot.slane %v223_v10, 1 }
 0x183   :  { %v225_v12 = vmin.f32 %v223_v10, %v224_v11 }
 0x185   :  { %vm226_vm10 = vcmp.eq.f32.partialorder %v1458_v62, %v225_v12  ;;  %v231_v62 = vld [vmem:[%s1670_s5 + $0x18] sm:$0xff] }
 0x186   :  { %v227_v15 = vsel %vm226_vm10, 1.0, %v208_v14  ;;  %239 = vst.msk [vmem:[#allocation2 + $0x18] sm:$0xff] %vm235_vm7, %v231_v62  ;;  %vm538_vm10 = vcmp.gt.f32.partialorder %v1562_v8, 0.0  ;;  %v748_v8 = vld [vmem:[#allocation3 + $0x4e0] sm:$0xff] }
 0x187   :  { %243 = vst.msk [vmem:[#allocation2] sm:$0xff] %vm171_vm3, %v227_v15  ;;  %778 = vmatpush.msra.mxu3 %v748_v8  ;;  %v451_v8 = vld [vmem:[#allocation5 + $0xa8] sm:$0xff] }
 0x188   :  { %1024 = vmatmul.f32.vlgmr.msra.gmra.mxu2 %v1444_v21 }
 0x18d   :  { %v1544_v46 = vld [vmem:[#allocation2 + $0x18] sm:$0xff] }
 0x18e   :  { %v1512_v20 = vld [vmem:[#allocation2] sm:$0xff]  ;;  %vm535_vm3 = vcmp.gt.f32.partialorder %v1544_v46, 0.0 }
 0x18f   :  { %vm532_vm12 = vcmp.gt.f32.partialorder %v1512_v20, 0.0 }
 0x196   :  { %v466_v42 = vpop.xlane.xlu2 %465 }
 0x19b   :  { %v460_v17 = vpop.xlane.xlu0 %459 }
 0x19e   :  { %v468_v50 = vpop.xlane.xlu2 %467 }
 0x1a3   :  { %v470_v61 = vpop.xlane.xlu0 %469 }
 0x1a9   :  { %v472_v4 = vpop.xlane.xlu2 %471 }
 0x1be   :  { %v462_v25 = vpop.xlane.xlu1 %461 }
 0x1c6   :  { %v464_v36 = vpop.xlane.xlu1 %463 }
 0x1d3   :  { %v490_v18 = vpop.f32.mrf.mxu2 }
 0x1d4   :  { %v491_v19 = vadd.f32 %v490_v18, %v460_v17 }
 0x1d6   :  { %v518_v22 = vmul.f32 0.2, %v491_v19  ;;  %vm511_vm11 = vcmp.gt.f32.partialorder %v491_v19, 0.0 }
 0x1d8   :  { %v525_v24 = vsel %vm511_vm11, %v491_v19, %v518_v22 }
 0x1d9   :  { %v1521_v26 = vsel %vm532_vm12, %v525_v24, -1e+30 }
 0x1da   :  { %v546_v27 = vsel %vm235_vm7, %v1521_v26, -inf }
 0x1db   :  { %v493_v28 = vpop.f32.mrf.mxu2  ;;  %547 = vmax.xlane.f32.xlu1 %v546_v27 }
 0x1dc   :  { %v494_v30 = vadd.f32 %v493_v28, %v462_v25 }
 0x1de   :  { %v519_v31 = vmul.f32 0.2, %v494_v30  ;;  %vm512_vm13 = vcmp.gt.f32.partialorder %v494_v30, 0.0 }
 0x1e0   :  { %v526_v33 = vsel %vm512_vm13, %v494_v30, %v519_v31 }
 0x1e1   :  { %v1534_v34 = vsel %vm533_vm14, %v526_v33, -1e+30 }
 0x1e2   :  { %v549_v35 = vsel %vm235_vm7, %v1534_v34, -inf }
 0x1e3   :  { %v496_v37 = vpop.f32.mrf.mxu2  ;;  %550 = vmax.xlane.f32.xlu0 %v549_v35 }
 0x1e4   :  { %v497_v39 = vadd.f32 %v496_v37, %v464_v36 }
 0x1e6   :  { %v520_v40 = vmul.f32 0.2, %v497_v39  ;;  %vm513_vm15 = vcmp.gt.f32.partialorder %v497_v39, 0.0 }
 0x1e8   :  { %v527_v41 = vsel %vm513_vm15, %v497_v39, %v520_v40 }
 0x1e9   :  { %v541_v43 = vsel %vm534_vm1, %v527_v41, -1e+30 }
 0x1ea   :  { %v552_v44 = vsel %vm235_vm7, %v541_v43, -inf }
 0x1eb   :  { %v499_v45 = vpop.f32.mrf.mxu2  ;;  %553 = vmax.xlane.f32.xlu1 %v552_v44 }
 0x1ec   :  { %v500_v47 = vadd.f32 %v499_v45, %v466_v42 }
 0x1ee   :  { %v521_v48 = vmul.f32 0.2, %v500_v47  ;;  %vm514_vm2 = vcmp.gt.f32.partialorder %v500_v47, 0.0 }
 0x1f0   :  { %v528_v49 = vsel %vm514_vm2, %v500_v47, %v521_v48 }
 0x1f1   :  { %v542_v51 = vsel %vm535_vm3, %v528_v49, -1e+30 }
 0x1f2   :  { %v555_v52 = vsel %vm235_vm7, %v542_v51, -inf }
 0x1f3   :  { %v502_v53 = vpop.f32.mrf.mxu2  ;;  %556 = vmax.xlane.f32.xlu2 %v555_v52 }
 0x1f4   :  { %v503_v55 = vadd.f32 %v502_v53, %v468_v50 }
 0x1f6   :  { %v522_v57 = vmul.f32 0.2, %v503_v55  ;;  %vm515_vm4 = vcmp.gt.f32.partialorder %v503_v55, 0.0 }
 0x1f8   :  { %v529_v58 = vsel %vm515_vm4, %v503_v55, %v522_v57 }
 0x1f9   :  { %v543_v59 = vsel %vm536_vm5, %v529_v58, -1e+30 }
 0x1fa   :  { %v558_v60 = vsel %vm235_vm7, %v543_v59, -inf }
 0x1fb   :  { %v505_v63 = vpop.f32.mrf.mxu2  ;;  %559 = vmax.xlane.f32.xlu0 %v558_v60 }
 0x1fc   :  { %v506_v1 = vadd.f32 %v505_v63, %v470_v61 }
 0x1fe   :  { %v523_v2 = vmul.f32 0.2, %v506_v1  ;;  %vm516_vm6 = vcmp.gt.f32.partialorder %v506_v1, 0.0 }
 0x200   :  { %v530_v3 = vsel %vm516_vm6, %v506_v1, %v523_v2 }
 0x201   :  { %v544_v5 = vsel %vm537_vm8, %v530_v3, -1e+30 }
 0x202   :  { %v561_v6 = vsel %vm235_vm7, %v544_v5, -inf }
 0x203   :  { %v508_v7 = vpop.f32.mrf.mxu2  ;;  %562 = vmax.xlane.f32.xlu1 %v561_v6 }
 0x204   :  { %v509_v10 = vadd.f32 %v508_v7, %v472_v4  ;;  %v747_v7 = vld [vmem:[#allocation3 + $0x4d8] sm:$0xff] }
 0x205   :  { %749 = vmatpush.msra.mxu1 %v747_v7 }
 0x206   :  { %v524_v11 = vmul.f32 0.2, %v509_v10  ;;  %vm517_vm9 = vcmp.gt.f32.partialorder %v509_v10, 0.0 }
 0x208   :  { %v531_v12 = vsel %vm517_vm9, %v509_v10, %v524_v11 }
 0x209   :  { %v545_v13 = vsel %vm538_vm10, %v531_v12, -1e+30 }
 0x20a   :  { %v564_v14 = vsel %vm235_vm7, %v545_v13, -inf }
 0x20b   :  { %565 = vmax.xlane.f32.xlu2 %v564_v14 }
 0x24e   :  { %v548_v15 = vpop.xlane.xlu1 %547 }
 0x24f   :  { %v567_v16 = vsub.f32 %v1521_v26, %v548_v15 }
 0x251   :  { %v574_v56 = vmul.f32 1.442695, %v567_v16 }
 0x253   :  { %1204 = vpow2.f32 %v574_v56 }
 0x256   :  { %v551_v62 = vpop.xlane.xlu0 %550 }
 0x257   :  { %v568_v9 = vsub.f32 %v1534_v34, %v551_v62 }
 0x259   :  { %v1205_v17 = vpop.eup %1204  ;;  %v576_v18 = vmul.f32 1.442695, %v568_v9 }
 0x25a   :  { %v588_v19 = vsel %vm532_vm12, %v1205_v17, 0.0 }
 0x25b   :  { %1206 = vpow2.f32 %v576_v18  ;;  %v595_v22 = vsel %vm235_vm7, %v588_v19, 0.0 }
 0x25c   :  { %596 = vadd.xlane.f32.xlu0 %v595_v22 }
 0x25e   :  { %v554_v23 = vpop.xlane.xlu1 %553 }
 0x25f   :  { %v569_v24 = vsub.f32 %v541_v43, %v554_v23  ;;  %v745_v23 = vld [vmem:[#allocation3 + $0x488] sm:$0xff] }
 0x260   :  { %750 = vmatpush.msra.mxu1 %v745_v23 }
 0x261   :  { %v1207_v25 = vpop.eup %1206  ;;  %v578_v27 = vmul.f32 1.442695, %v569_v24  ;;  %v746_v24 = vld [vmem:[#allocation3 + $0x490] sm:$0xff] }
 0x262   :  { %v589_v26 = vsel %vm533_vm14, %v1207_v25, 0.0  ;;  %779 = vmatpush.msra.mxu3 %v746_v24  ;;  %v743_v25 = vld [vmem:[#allocation3 + $0x438] sm:$0xff] }
 0x263   :  { %1208 = vpow2.f32 %v578_v27  ;;  %v598_v28 = vsel %vm235_vm7, %v589_v26, 0.0  ;;  %v744_v27 = vld [vmem:[#allocation3 + $0x440] sm:$0xff]  ;;  %751 = vmatpush.msra.mxu1 %v743_v25 }
 0x264   :  { %599 = vadd.xlane.f32.xlu1 %v598_v28  ;;  %780 = vmatpush.msra.mxu3 %v744_v27  ;;  %v742_v28 = vld [vmem:[#allocation3 + $0x3f0] sm:$0xff] }
 0x266   :  { %v557_v30 = vpop.xlane.xlu2 %556  ;;  %781 = vmatpush.msra.mxu3 %v742_v28  ;;  %v822_v28 = vld [vmem:[#allocation5 + $0xb0] sm:$0xff] }
 0x267   :  { %v570_v31 = vsub.f32 %v542_v51, %v557_v30  ;;  %v739_v30 = vld [vmem:[#allocation3 + $0x398] sm:$0xff] }
 0x269   :  { %v1209_v32 = vpop.eup %1208  ;;  %v580_v20 = vmul.f32 1.442695, %v570_v31  ;;  %v740_v31 = vld [vmem:[#allocation3 + $0x3a0] sm:$0xff] }
 0x26a   :  { %v590_v33 = vsel %vm534_vm1, %v1209_v32, 0.0  ;;  %782 = vmatpush.msra.mxu3 %v740_v31  ;;  %v737_v32 = vld [vmem:[#allocation3 + $0x348] sm:$0xff]  ;;  %v1099_v31 = vld [vmem:[#allocation3 + $0x450] sm:$0xff] }
 0x26b   :  { %1210 = vpow2.f32 %v580_v20  ;;  %v601_v34 = vsel %vm235_vm7, %v590_v33, 0.0  ;;  %v738_v20 = vld [vmem:[#allocation3 + $0x350] sm:$0xff] }
 0x26c   :  { %602 = vadd.xlane.f32.xlu2 %v601_v34  ;;  %783 = vmatpush.msra.mxu3 %v738_v20  ;;  %v736_v34 = vld [vmem:[#allocation3 + $0x300] sm:$0xff]  ;;  %v1097_v20 = vld [vmem:[#allocation3 + $0x3b0] sm:$0xff] }
 0x26e   :  { %v560_v35 = vpop.xlane.xlu0 %559  ;;  %784 = vmatpush.msra.mxu3 %v736_v34  ;;  %v1096_v34 = vld [vmem:[#allocation3 + $0x360] sm:$0xff] }
 0x26f   :  { %v571_v36 = vsub.f32 %v543_v59, %v560_v35  ;;  %v733_v35 = vld [vmem:[#allocation3 + $0x2a8] sm:$0xff] }
 0x271   :  { %v1211_v37 = vpop.eup %1210  ;;  %v582_v29 = vmul.f32 1.442695, %v571_v36  ;;  %v734_v36 = vld [vmem:[#allocation3 + $0x2b0] sm:$0xff] }
 0x272   :  { %v591_v39 = vsel %vm535_vm3, %v1211_v37, 0.0  ;;  %v731_v37 = vld [vmem:[#allocation3 + $0x258] sm:$0xff]  ;;  %785 = vmatpush.msra.mxu3 %v734_v36  ;;  %v1094_v36 = vld [vmem:[#allocation3 + $0x2c0] sm:$0xff] }
 0x273   :  { %1212 = vpow2.f32 %v582_v29  ;;  %v604_v40 = vsel %vm235_vm7, %v591_v39, 0.0  ;;  %v732_v29 = vld [vmem:[#allocation3 + $0x260] sm:$0xff] }
 0x274   :  { %605 = vadd.xlane.f32.xlu0 %v604_v40  ;;  %786 = vmatpush.msra.mxu3 %v732_v29  ;;  %v730_v40 = vld [vmem:[#allocation3 + $0x210] sm:$0xff]  ;;  %v824_v29 = vld [vmem:[#allocation5 + $0xc0] sm:$0xff] }
 0x276   :  { %v563_v41 = vpop.xlane.xlu1 %562  ;;  %787 = vmatpush.msra.mxu3 %v730_v40  ;;  %v1091_v40 = vld [vmem:[#allocation3 + $0x1d0] sm:$0xff] }
 0x277   :  { %v572_v42 = vsub.f32 %v544_v5, %v563_v41  ;;  %v727_v41 = vld [vmem:[#allocation3 + $0x1b8] sm:$0xff] }
 0x279   :  { %v1213_v43 = vpop.eup %1212  ;;  %v584_v38 = vmul.f32 1.442695, %v572_v42  ;;  %v728_v42 = vld [vmem:[#allocation3 + $0x1c0] sm:$0xff] }
 0x27a   :  { %v592_v44 = vsel %vm536_vm5, %v1213_v43, 0.0  ;;  %788 = vmatpush.msra.mxu3 %v728_v42  ;;  %v725_v43 = vld [vmem:[#allocation3 + $0x168] sm:$0xff]  ;;  %v1089_v42 = vld [vmem:[#allocation3 + $0x130] sm:$0xff] }
 0x27b   :  { %1214 = vpow2.f32 %v584_v38  ;;  %v607_v45 = vsel %vm235_vm7, %v592_v44, 0.0  ;;  %v726_v38 = vld [vmem:[#allocation3 + $0x170] sm:$0xff] }
 0x27c   :  { %608 = vadd.xlane.f32.xlu1 %v607_v45  ;;  %v724_v45 = vld [vmem:[#allocation3 + $0x120] sm:$0xff]  ;;  %789 = vmatpush.msra.mxu3 %v726_v38 }
 0x27d   :  { %v1088_v38 = vld [vmem:[#allocation3 + $0xe0] sm:$0xff] }
 0x27e   :  { %v566_v47 = vpop.xlane.xlu2 %565  ;;  %790 = vmatpush.msra.mxu3 %v724_v45  ;;  %v1086_v45 = vld [vmem:[#allocation3 + $0x40] sm:$0xff] }
 0x27f   :  { %v573_v48 = vsub.f32 %v545_v13, %v566_v47  ;;  %v721_v47 = vld [vmem:[#allocation3 + $0xc8] sm:$0xff] }
 0x281   :  { %v1215_v49 = vpop.eup %1214  ;;  %v586_v46 = vmul.f32 1.442695, %v573_v48  ;;  %v722_v48 = vld [vmem:[#allocation3 + $0xd0] sm:$0xff] }
 0x282   :  { %v593_v50 = vsel %vm537_vm8, %v1215_v49, 0.0  ;;  %791 = vmatpush.msra.mxu3 %v722_v48  ;;  %v719_v49 = vld [vmem:[#allocation3 + $0x78] sm:$0xff] }
 0x283   :  { %1216 = vpow2.f32 %v586_v46  ;;  %v610_v51 = vsel %vm235_vm7, %v593_v50, 0.0  ;;  %v720_v46 = vld [vmem:[#allocation3 + $0x80] sm:$0xff] }
 0x284   :  { %611 = vadd.xlane.f32.xlu2 %v610_v51  ;;  %792 = vmatpush.msra.mxu3 %v720_v46  ;;  %v718_v51 = vld [vmem:[#allocation3 + $0x30] sm:$0xff] }
 0x286   :  { %793 = vmatpush.msra.mxu3 %v718_v51 }
 0x289   :  { %v1217_v52 = vpop.eup %1216 }
 0x28a   :  { %v594_v53 = vsel %vm538_vm10, %v1217_v52, 0.0 }
 0x28b   :  { %v613_v54 = vsel %vm235_vm7, %v594_v53, 0.0 }
 0x28c   :  { %614 = vadd.xlane.f32.xlu0 %v613_v54 }
 0x2cf   :  { %v597_v55 = vpop.xlane.xlu0 %596 }
 0x2d0   :  { %v616_v57 = vmax.f32 %v597_v55, 1e-20  ;;  %v448_v55 = vld [vmem:[#allocation5 + $0x90] sm:$0xff] }
 0x2d2   :  { %1218 = vrcp.f32 %v616_v57 }
 0x2d7   :  { %v600_v58 = vpop.xlane.xlu1 %599 }
 0x2d8   :  { %v1219_v59 = vpop.eup %1218  ;;  %v617_v60 = vmax.f32 %v600_v58, 1e-20 }
 0x2d9   :  { %v630_v61 = vmul.f32 %v1219_v59, %v588_v19 }
 0x2da   :  { %1220 = vrcp.f32 %v617_v60 }
 0x2db   :  { %1182 = vmatmul.msk.f32.vlgmr.msrb.gmra.mxu0 %vm235_vm7, %v630_v61  ;;  %v449_v61 = vld [vmem:[#allocation5 + $0x98] sm:$0xff] }
 0x2df   :  { %v603_v63 = vpop.xlane.xlu2 %602 }
 0x2e0   :  { %v1221_v0 = vpop.eup %1220  ;;  %v618_v1 = vmax.f32 %v603_v63, 1e-20 }
 0x2e1   :  { %v631_v2 = vmul.f32 %v1221_v0, %v589_v26  ;;  %v741_v26 = vld [vmem:[#allocation3 + $0x3e8] sm:$0xff] }
 0x2e2   :  { %1222 = vrcp.f32 %v618_v1  ;;  %752 = vmatpush.msra.mxu1 %v741_v26  ;;  %v1101_v26 = vld [vmem:[#allocation3 + $0x4f0] sm:$0xff] }
 0x2e3   :  { %1183 = vmatmul.msk.f32.gmra.mxu0 %vm235_vm7, %v631_v2 }
 0x2e4   :  { %753 = vmatpush.msra.mxu1 %v739_v30  ;;  %v1100_v30 = vld [vmem:[#allocation3 + $0x4a0] sm:$0xff] }
 0x2e6   :  { %754 = vmatpush.msra.mxu1 %v737_v32  ;;  %v1098_v32 = vld [vmem:[#allocation3 + $0x400] sm:$0xff] }
 0x2e7   :  { %v606_v3 = vpop.xlane.xlu0 %605 }
 0x2e8   :  { %v1223_v4 = vpop.eup %1222  ;;  %v619_v5 = vmax.f32 %v606_v3, 1e-20  ;;  %v450_v3 = vld [vmem:[#allocation5 + $0xa0] sm:$0xff] }
 0x2e9   :  { %v632_v6 = vmul.f32 %v1223_v4, %v590_v33  ;;  %v735_v33 = vld [vmem:[#allocation3 + $0x2f8] sm:$0xff] }
 0x2ea   :  { %1224 = vrcp.f32 %v619_v5  ;;  %755 = vmatpush.msra.mxu1 %v735_v33  ;;  %v823_v33 = vld [vmem:[#allocation5 + $0xb8] sm:$0xff] }
 0x2eb   :  { %1184 = vmatmul.msk.f32.gmra.mxu0 %vm235_vm7, %v632_v6 }
 0x2ec   :  { %756 = vmatpush.msra.mxu1 %v733_v35  ;;  %v1095_v35 = vld [vmem:[#allocation3 + $0x310] sm:$0xff] }
 0x2ee   :  { %757 = vmatpush.msra.mxu1 %v731_v37  ;;  %v1093_v37 = vld [vmem:[#allocation3 + $0x270] sm:$0xff] }
 0x2ef   :  { %v609_v10 = vpop.xlane.xlu1 %608 }
 0x2f0   :  { %v1225_v11 = vpop.eup %1224  ;;  %v620_v12 = vmax.f32 %v609_v10, 1e-20 }
 0x2f1   :  { %v633_v13 = vmul.f32 %v1225_v11, %v591_v39  ;;  %v729_v39 = vld [vmem:[#allocation3 + $0x208] sm:$0xff] }
 0x2f2   :  { %1226 = vrcp.f32 %v620_v12  ;;  %758 = vmatpush.msra.mxu1 %v729_v39  ;;  %v1092_v39 = vld [vmem:[#allocation3 + $0x220] sm:$0xff] }
 0x2f3   :  { %1185 = vmatmul.msk.f32.gmra.mxu0 %vm235_vm7, %v633_v13 }
 0x2f4   :  { %759 = vmatpush.msra.mxu1 %v727_v41  ;;  %v1090_v41 = vld [vmem:[#allocation3 + $0x180] sm:$0xff] }
 0x2f6   :  { %760 = vmatpush.msra.mxu1 %v725_v43  ;;  %v825_v43 = vld [vmem:[#allocation5 + $0xc8] sm:$0xff] }
 0x2f7   :  { %v612_v14 = vpop.xlane.xlu2 %611 }
 0x2f8   :  { %v1227_v15 = vpop.eup %1226  ;;  %v621_v16 = vmax.f32 %v612_v14, 1e-20  ;;  %v826_v14 = vld [vmem:[#allocation5 + $0xd0] sm:$0xff] }
 0x2f9   :  { %v634_v56 = vmul.f32 %v1227_v15, %v592_v44  ;;  %v723_v44 = vld [vmem:[#allocation3 + $0x118] sm:$0xff] }
 0x2fa   :  { %1228 = vrcp.f32 %v621_v16  ;;  %761 = vmatpush.msra.mxu1 %v723_v44  ;;  %v1087_v44 = vld [vmem:[#allocation3 + $0x90] sm:$0xff] }
 0x2fb   :  { %1186 = vmatmul.msk.f32.gmra.mxu0 %vm235_vm7, %v634_v56 }
 0x2fc   :  { %762 = vmatpush.msra.mxu1 %v721_v47 }
 0x2fe   :  { %763 = vmatpush.msra.mxu1 %v719_v49  ;;  %v818_v49 = vld [vmem:[#allocation7] sm:$0xff] }
 0x2ff   :  { %v615_v62 = vpop.xlane.xlu0 %614  ;;  %vm885_vm15 = vcmp.gt.f32.partialorder %v818_v49, 0.0 }
 0x300   :  { %v1229_v9 = vpop.eup %1228  ;;  %v622_v17 = vmax.f32 %v615_v62, 1e-20  ;;  %v827_v62 = vld [vmem:[#allocation5 + $0xd8] sm:$0xff] }
 0x301   :  { %v635_v18 = vmul.f32 %v1229_v9, %v593_v50  ;;  %v717_v50 = vld [vmem:[#allocation3 + $0x28] sm:$0xff] }
 0x302   :  { %1230 = vrcp.f32 %v622_v17  ;;  %764 = vmatpush.msra.mxu1 %v717_v50 }
 0x303   :  { %1187 = vmatmul.msk.f32.gmra.mxu0 %vm235_vm7, %v635_v18 }
 0x308   :  { %v1231_v19 = vpop.eup %1230 }
 0x309   :  { %v636_v22 = vmul.f32 %v1231_v19, %v594_v53 }
 0x30b   :  { %1188 = vmatmul.msk.f32.gmra.mxu0 %vm235_vm7, %v636_v22  ;;  %v828_v22 = vld [vmem:[#allocation5 + $0xe0] sm:$0xff] }
 0x358   :  { %v1598_v52 = vpop.f32.mrf.mxu0 }
 0x360   :  { %v1600_v53 = vpop.f32.mrf.mxu0 }
 0x368   :  { %v1602_v54 = vpop.f32.mrf.mxu0 }
 0x370   :  { %v684_v57 = vpop.f32.mrf.mxu0 }
 0x371   :  { %v685_v58 = vadd.f32 %v684_v57, %v448_v55 }
 0x373   :  { %vm699_vm7 = vcmp.gt.f32.partialorder %v685_v58, 0.0  ;;  %v706_v59 = vmul.f32 0.01, %v685_v58 }
 0x375   :  { %v713_v60 = vsel %vm699_vm7, %v685_v58, %v706_v59 }
 0x376   :  { %765 = vmatmul.f32.vlgmr.msra.gmra.mxu1 %v713_v60  ;;  %794 = vmatmul.f32.vlgmr.msra.gmra.mxu3 %v713_v60  ;;  %v819_v60 = vld [vmem:[#allocation7 + $0x8] sm:$0xff] }
 0x377   :  { %vm886_vm2 = vcmp.gt.f32.partialorder %v819_v60, 0.0 }
 0x378   :  { %v687_v63 = vpop.f32.mrf.mxu0 }
 0x379   :  { %v688_v0 = vadd.f32 %v687_v63, %v449_v61 }
 0x37b   :  { %vm700_vm11 = vcmp.gt.f32.partialorder %v688_v0, 0.0  ;;  %v707_v1 = vmul.f32 0.01, %v688_v0 }
 0x37d   :  { %v714_v2 = vsel %vm700_vm11, %v688_v0, %v707_v1 }
 0x37e   :  { %768 = vmatmul.f32.gmra.mxu1 %v714_v2  ;;  %797 = vmatmul.f32.gmra.mxu3 %v714_v2 }
 0x380   :  { %v690_v4 = vpop.f32.mrf.mxu0 }
 0x381   :  { %v691_v5 = vadd.f32 %v690_v4, %v450_v3  ;;  %v820_v4 = vld [vmem:[#allocation7 + $0x10] sm:$0xff] }
 0x382   :  { %vm887_vm4 = vcmp.gt.f32.partialorder %v820_v4, 0.0  ;;  %v831_v4 = vld [vmem:[#allocation5 + $0x100] sm:$0xff] }
 0x383   :  { %vm701_vm12 = vcmp.gt.f32.partialorder %v691_v5, 0.0  ;;  %v708_v6 = vmul.f32 0.01, %v691_v5 }
 0x385   :  { %v715_v7 = vsel %vm701_vm12, %v691_v5, %v708_v6 }
 0x386   :  { %771 = vmatmul.f32.gmra.mxu1 %v715_v7  ;;  %800 = vmatmul.f32.gmra.mxu3 %v715_v7 }
 0x388   :  { %v693_v10 = vpop.f32.mrf.mxu0 }
 0x389   :  { %v694_v11 = vadd.f32 %v693_v10, %v451_v8 }
 0x38b   :  { %vm702_vm13 = vcmp.gt.f32.partialorder %v694_v11, 0.0  ;;  %v709_v12 = vmul.f32 0.01, %v694_v11 }
 0x38d   :  { %v716_v13 = vsel %vm702_vm13, %v694_v11, %v709_v12 }
 0x38e   :  { %774 = vmatmul.f32.gmra.mxu1 %v716_v13  ;;  %803 = vmatmul.f32.gmra.mxu3 %v716_v13 }
 0x3f3   :  { %v766_v15 = vpop.f32.mrf.mxu1 }
 0x3f4   :  { %v832_v16 = vmul.f32 %v826_v14, %v766_v15  ;;  %v446_v14 = vld [vmem:[#allocation5 + $0x80] sm:$0xff] }
 0x3f6   :  { %836 = vadd.xlane.f32.xlu1 %v832_v16  ;;  %v679_v16 = vadd.f32 %v1600_v53, %v446_v14  ;;  %v1115_v14 = vld [vmem:[#allocation3 + $0x458] sm:$0xff] }
 0x3f8   :  { %vm697_vm5 = vcmp.gt.f32.partialorder %v679_v16, 0.0 }
 0x3f9   :  { %v795_v56 = vpop.f32.mrf.mxu3 }
 0x3fb   :  { %v769_v9 = vpop.f32.mrf.mxu1 }
 0x3fc   :  { %v833_v17 = vmul.f32 %v827_v62, %v769_v9 }
 0x3fe   :  { %838 = vadd.xlane.f32.xlu2 %v833_v17 }
 0x401   :  { %v798_v18 = vpop.f32.mrf.mxu3 }
 0x402   :  { %v704_v18 = vmul.f32 0.01, %v679_v16 }
 0x403   :  { %v772_v19 = vpop.f32.mrf.mxu1 }
 0x409   :  { %v801_v23 = vpop.f32.mrf.mxu3 }
 0x40a   :  { %v834_v24 = vmul.f32 %v828_v22, %v801_v23  ;;  %v1202_v22 = vld [vmem:[#allocation5 + $0x1] ss:$0 sm:$0xff] }
 0x40b   :  { %v775_v25 = vpop.f32.mrf.mxu1 }
 0x40c   :  { %840 = vadd.xlane.f32.xlu0 %v834_v24  ;;  %v1025_v24 = vpop.f32.mrf.mxu2 }
 0x40d   :  { %v1026_v53 = vadd.f32 %v1202_v22, %v1025_v24 }
 0x411   :  { %v1604_v27 = vpop.f32.mrf.mxu3 }
 0x412   :  { %856 = vmatpush.xpose.msra.mxu0 %v1604_v27  ;;  %969 = vmatpush.msrb.mxu1 %v1604_v27 }
 0x414   :  { %970 = vmatpush.msrb.mxu1 %v801_v23 }
 0x416   :  { %857 = vmatpush.xpose.msra.mxu0 %v801_v23  ;;  %971 = vmatpush.msrb.mxu1 %v769_v9  ;;  %v447_v23 = vld [vmem:[#allocation5 + $0x88] sm:$0xff] }
 0x418   :  { %972 = vmatpush.msrb.mxu1 %v766_v15 }
 0x41a   :  { %858 = vmatpush.xpose.msra.mxu0 %v769_v9 }
 0x41e   :  { %859 = vmatpush.xpose.msra.mxu0 %v766_v15 }
 0x421   :  { %860 = vmatmul.f32.vlgmr.msra.gmra.mxu0 %v822_v28 }
 0x422   :  { %1138 = vmatpush.msrb.mxu0 %v1101_v26  ;;  %v682_v26 = vadd.f32 %v1602_v54, %v447_v23  ;;  %v1112_v23 = vld [vmem:[#allocation3 + $0x368] sm:$0xff] }
 0x424   :  { %1139 = vmatpush.msrb.mxu0 %v1100_v30  ;;  %v1619_v30 = vsel %vm697_vm5, %v679_v16, %v704_v18  ;;  %vm698_vm6 = vcmp.gt.f32.partialorder %v682_v26, 0.0  ;;  %v1114_v16 = vld [vmem:[#allocation3 + $0x408] sm:$0xff]  ;;  %v1113_v18 = vld [vmem:[#allocation3 + $0x3b8] sm:$0xff] }
 0x426   :  { %1140 = vmatpush.msrb.mxu0 %v1099_v31 }
 0x428   :  { %1141 = vmatpush.msrb.mxu0 %v1098_v32 }
 0x429   :  { %863 = vmatmul.f32.gmra.mxu0 %v823_v33  ;;  %v1028_v33 = vmul.f32 %v1026_v53, %v1619_v30 }
 0x42a   :  { %1142 = vmatpush.msrb.mxu0 %v1097_v20 }
 0x42c   :  { %1143 = vmatpush.msrb.mxu0 %v1096_v34  ;;  %v705_v34 = vmul.f32 0.01, %v682_v26 }
 0x42e   :  { %1144 = vmatpush.msrb.mxu0 %v1095_v35 }
 0x430   :  { %1145 = vmatpush.msrb.mxu0 %v1094_v36  ;;  %v445_v36 = vld [vmem:[#allocation5 + $0x78] sm:$0xff] }
 0x431   :  { %866 = vmatmul.f32.gmra.mxu0 %v824_v29  ;;  %v676_v54 = vadd.f32 %v1598_v52, %v445_v36 }
 0x432   :  { %1146 = vmatpush.msrb.mxu0 %v1093_v37  ;;  %v1625_v37 = vsel %vm698_vm6, %v682_v26, %v705_v34 }
 0x433   :  { %vm696_vm8 = vcmp.gt.f32.partialorder %v676_v54, 0.0 }
 0x434   :  { %1147 = vmatpush.msrb.mxu0 %v1092_v39  ;;  %v1032_v39 = vmul.f32 %v1026_v53, %v1625_v37 }
 0x436   :  { %1148 = vmatpush.msrb.mxu0 %v1091_v40 }
 0x438   :  { %1149 = vmatpush.msrb.mxu0 %v1090_v41  ;;  %v703_v41 = vmul.f32 0.01, %v676_v54 }
 0x439   :  { %869 = vmatmul.f32.gmra.mxu0 %v825_v43 }
 0x43a   :  { %1150 = vmatpush.msrb.mxu0 %v1089_v42  ;;  %v1630_v43 = vsel %vm696_vm8, %v676_v54, %v703_v41  ;;  %v1109_v54 = vld [vmem:[#allocation3 + $0x278] sm:$0xff] }
 0x43b   :  { %v1107_v41 = vld [vmem:[#allocation3 + $0x1d8] sm:$0xff] }
 0x43c   :  { %1151 = vmatpush.msrb.mxu0 %v1088_v38  ;;  %v1044_v38 = vmul.f32 %v1026_v53, %v1630_v43 }
 0x43e   :  { %1152 = vmatpush.msrb.mxu0 %v1087_v44 }
 0x440   :  { %1153 = vmatpush.msrb.mxu0 %v1086_v45 }
 0x441   :  { %1154 = vmatmul.f32.vlgmr.msrb.gmra.mxu0 %v1444_v21 }
 0x469   :  { %v837_v47 = vpop.xlane.xlu1 %836 }
 0x471   :  { %v839_v58 = vpop.xlane.xlu2 %838 }
 0x47f   :  { %v841_v2 = vpop.xlane.xlu0 %840 }
 0x49e   :  { %v861_v48 = vpop.f32.mrf.mxu0 }
 0x49f   :  { %v862_v46 = vadd.f32 %v861_v48, %v837_v47 }
 0x4a1   :  { %v877_v50 = vmul.f32 0.2, %v862_v46  ;;  %vm873_vm14 = vcmp.gt.f32.partialorder %v862_v46, 0.0 }
 0x4a3   :  { %v881_v51 = vsel %vm873_vm14, %v862_v46, %v877_v50 }
 0x4a4   :  { %v889_v55 = vsel %vm885_vm15, %v881_v51, -1e+30 }
 0x4a5   :  { %v893_v57 = vsel %vm88_vm0, %v889_v55, -inf }
 0x4a6   :  { %v864_v59 = vpop.f32.mrf.mxu0  ;;  %894 = vmax.xlane.f32.xlu1 %v893_v57 }
 0x4a7   :  { %v865_v61 = vadd.f32 %v864_v59, %v839_v58  ;;  %v830_v59 = vld [vmem:[#allocation5 + $0xf0] sm:$0xff] }
 0x4a9   :  { %v878_v63 = vmul.f32 0.2, %v865_v61  ;;  %vm874_vm1 = vcmp.gt.f32.partialorder %v865_v61, 0.0 }
 0x4ab   :  { %v882_v21 = vsel %vm874_vm1, %v865_v61, %v878_v63 }
 0x4ac   :  { %v890_v0 = vsel %vm886_vm2, %v882_v21, -1e+30 }
 0x4ad   :  { %v896_v1 = vsel %vm88_vm0, %v890_v0, -inf }
 0x4ae   :  { %v867_v3 = vpop.f32.mrf.mxu0  ;;  %897 = vmax.xlane.f32.xlu2 %v896_v1 }
 0x4af   :  { %v868_v5 = vadd.f32 %v867_v3, %v841_v2  ;;  %v829_v2 = vld [vmem:[#allocation5 + $0xe8] sm:$0xff] }
 0x4b0   :  { %v835_v3 = vmul.f32 %v829_v2, %v1604_v27 }
 0x4b1   :  { %v879_v6 = vmul.f32 0.2, %v868_v5  ;;  %vm875_vm3 = vcmp.gt.f32.partialorder %v868_v5, 0.0 }
 0x4b3   :  { %v883_v7 = vsel %vm875_vm3, %v868_v5, %v879_v6 }
 0x4b4   :  { %v891_v8 = vsel %vm887_vm4, %v883_v7, -1e+30 }
 0x4b5   :  { %v899_v10 = vsel %vm88_vm0, %v891_v8, -inf }
 0x4b6   :  { %900 = vmax.xlane.f32.xlu0 %v899_v10  ;;  %v870_v27 = vpop.f32.mrf.mxu0 }
 0x519   :  { %v895_v11 = vpop.xlane.xlu1 %894 }
 0x51a   :  { %v905_v12 = vsub.f32 %v889_v55, %v895_v11 }
 0x51c   :  { %v909_v13 = vmul.f32 1.442695, %v905_v12  ;;  %v1117_v12 = vld [vmem:[#allocation3 + $0x4f8] sm:$0xff] }
 0x51d   :  { %1118 = vmatpush.msrb.mxu3 %v1117_v12 }
 0x51e   :  { %1232 = vpow2.f32 %v909_v13  ;;  %v1116_v13 = vld [vmem:[#allocation3 + $0x4a8] sm:$0xff] }
 0x51f   :  { %1119 = vmatpush.msrb.mxu3 %v1116_v13 }
 0x521   :  { %v898_v15 = vpop.xlane.xlu2 %897  ;;  %1120 = vmatpush.msrb.mxu3 %v1115_v14 }
 0x522   :  { %v906_v56 = vsub.f32 %v890_v0, %v898_v15 }
 0x523   :  { %1121 = vmatpush.msrb.mxu3 %v1114_v16 }
 0x524   :  { %v1233_v62 = vpop.eup %1232  ;;  %v911_v9 = vmul.f32 1.442695, %v906_v56 }
 0x525   :  { %v917_v17 = vsel %vm885_vm15, %v1233_v62, 0.0  ;;  %1122 = vmatpush.msrb.mxu3 %v1113_v18 }
 0x526   :  { %1234 = vpow2.f32 %v911_v9  ;;  %v921_v19 = vsel %vm88_vm0, %v917_v17, 0.0  ;;  %v1643_v9 = vld [vmem:[#allocation7 + $0x18] sm:$0xff] }
 0x527   :  { %922 = vadd.xlane.f32.xlu1 %v921_v19  ;;  %vm888_vm11 = vcmp.gt.f32.partialorder %v1643_v9, 0.0  ;;  %1123 = vmatpush.msrb.mxu3 %v1112_v23 }
 0x529   :  { %v901_v25 = vpop.xlane.xlu0 %900 }
 0x52a   :  { %v907_v28 = vsub.f32 %v891_v8, %v901_v25 }
 0x52c   :  { %v1235_v31 = vpop.eup %1234  ;;  %v913_v32 = vmul.f32 1.442695, %v907_v28  ;;  %v1111_v28 = vld [vmem:[#allocation3 + $0x318] sm:$0xff] }
 0x52d   :  { %v918_v20 = vsel %vm886_vm2, %v1235_v31, 0.0  ;;  %1124 = vmatpush.msrb.mxu3 %v1111_v28  ;;  %v1155_v28 = vpop.f32.mrf.mxu0 }
 0x52e   :  { %1236 = vpow2.f32 %v913_v32  ;;  %v924_v35 = vsel %vm88_vm0, %v918_v20, 0.0 }
 0x52f   :  { %925 = vadd.xlane.f32.xlu2 %v924_v35  ;;  %1029 = vadd.xlane.f32.xlu1 %v1028_v33 }
 0x534   :  { %v1237_v29 = vpop.eup %1236 }
 0x535   :  { %v919_v40 = vsel %vm887_vm4, %v1237_v29, 0.0  ;;  %v1108_v29 = vld [vmem:[#allocation3 + $0x228] sm:$0xff] }
 0x536   :  { %v927_v42 = vsel %vm88_vm0, %v919_v40, 0.0 }
 0x537   :  { %1033 = vadd.xlane.f32.xlu2 %v1032_v39  ;;  %928 = vadd.xlane.f32.xlu0 %v927_v42 }
 0x53f   :  { %1045 = vadd.xlane.f32.xlu2 %v1044_v38  ;;  %v1106_v38 = vld [vmem:[#allocation3 + $0x188] sm:$0xff] }
 0x59a   :  { %v923_v44 = vpop.xlane.xlu1 %922 }
 0x59b   :  { %v933_v52 = vmax.f32 %v923_v44, 1e-20 }
 0x59d   :  { %1238 = vrcp.f32 %v933_v52 }
 0x5a2   :  { %v926_v45 = vpop.xlane.xlu2 %925  ;;  %v1030_v56 = vpop.xlane.xlu1 %1029 }
 0x5a3   :  { %v1239_v47 = vpop.eup %1238  ;;  %v934_v48 = vmax.f32 %v926_v45, 1e-20  ;;  %v1031_v24 = vmul.f32 0.17677669, %v1030_v56 }
 0x5a4   :  { %v941_v49 = vmul.f32 %v1239_v47, %v917_v17  ;;  %v1105_v47 = vld [vmem:[#allocation3 + $0x138] sm:$0xff] }
 0x5a5   :  { %1240 = vrcp.f32 %v934_v48 }
 0x5a6   :  { %1189 = vmatmul.msk.f32.vlgmr.msrb.gmra.mxu1 %vm88_vm0, %v941_v49 }
 0x5aa   :  { %v929_v46 = vpop.xlane.xlu0 %928  ;;  %v1034_v15 = vpop.xlane.xlu2 %1033 }
 0x5ab   :  { %v1241_v50 = vpop.eup %1240  ;;  %v935_v51 = vmax.f32 %v929_v46, 1e-20  ;;  %v1035_v19 = vmul.f32 0.17677669, %v1034_v15 }
 0x5ac   :  { %v942_v55 = vmul.f32 %v1241_v50, %v918_v20  ;;  %v1110_v20 = vld [vmem:[#allocation3 + $0x2c8] sm:$0xff] }
 0x5ad   :  { %1242 = vrcp.f32 %v935_v51  ;;  %v1048_v31 = vmax.f32 %v1031_v24, %v1035_v19  ;;  %1125 = vmatpush.msrb.mxu3 %v1110_v20  ;;  %v1104_v50 = vld [vmem:[#allocation3 + $0xe8] sm:$0xff] }
 0x5ae   :  { %1190 = vmatmul.msk.f32.gmra.mxu1 %vm88_vm0, %v942_v55 }
 0x5af   :  { %1126 = vmatpush.msrb.mxu3 %v1109_v54 }
 0x5b1   :  { %1127 = vmatpush.msrb.mxu3 %v1108_v29 }
 0x5b2   :  { %v1046_v33 = vpop.xlane.xlu2 %1045 }
 0x5b3   :  { %v1243_v57 = vpop.eup %1242  ;;  %v1047_v39 = vmul.f32 0.17677669, %v1046_v33  ;;  %1128 = vmatpush.msrb.mxu3 %v1107_v41 }
 0x5b4   :  { %v943_v58 = vmul.f32 %v1243_v57, %v919_v40  ;;  %v1103_v57 = vld [vmem:[#allocation3 + $0x98] sm:$0xff] }
 0x5b5   :  { %1129 = vmatpush.msrb.mxu3 %v1106_v38 }
 0x5b6   :  { %1191 = vmatmul.msk.f32.gmra.mxu1 %vm88_vm0, %v943_v58 }
 0x5b7   :  { %1130 = vmatpush.msrb.mxu3 %v1105_v47 }
 0x5b9   :  { %1131 = vmatpush.msrb.mxu3 %v1104_v50 }
 0x5bb   :  { %1132 = vmatpush.msrb.mxu3 %v1103_v57 }
 0x623   :  { %v974_v60 = vpop.f32.mrf.mxu1 }
 0x624   :  { %v975_v61 = vadd.f32 %v974_v60, %v830_v59  ;;  %v1102_v59 = vld [vmem:[#allocation3 + $0x48] sm:$0xff] }
 0x625   :  { %1133 = vmatpush.msrb.mxu3 %v1102_v59 }
 0x626   :  { %v986_v63 = vmul.f32 0.01, %v975_v61  ;;  %vm984_vm9 = vcmp.gt.f32.partialorder %v975_v61, 0.0 }
 0x628   :  { %v1636_v21 = vsel %vm984_vm9, %v975_v61, %v986_v63 }
 0x629   :  { %v1036_v0 = vmul.f32 %v1026_v53, %v1636_v21 }
 0x62b   :  { %v977_v1 = vpop.f32.mrf.mxu1  ;;  %1037 = vadd.xlane.f32.xlu0 %v1036_v0 }
 0x633   :  { %842 = vadd.xlane.f32.xlu0 %v835_v3  ;;  %v979_v5 = vpop.f32.mrf.mxu1 }
 0x634   :  { %v980_v6 = vadd.f32 %v979_v5, %v831_v4 }
 0x636   :  { %v987_v7 = vmul.f32 0.01, %v980_v6  ;;  %vm985_vm10 = vcmp.gt.f32.partialorder %v980_v6, 0.0 }
 0x638   :  { %v1640_v8 = vsel %vm985_vm10, %v980_v6, %v987_v7 }
 0x639   :  { %v1040_v10 = vmul.f32 %v1026_v53, %v1640_v8 }
 0x63b   :  { %1041 = vadd.xlane.f32.xlu1 %v1040_v10 }
 0x69e   :  { %v1038_v11 = vpop.xlane.xlu0 %1037 }
 0x69f   :  { %v1039_v25 = vmul.f32 0.17677669, %v1038_v11 }
 0x6a1   :  { %v1049_v35 = vmax.f32 %v1048_v31, %v1039_v25 }
 0x6a6   :  { %v843_v62 = vpop.xlane.xlu0 %842 }
 0x6a7   :  { %v871_v17 = vadd.f32 %v870_v27, %v843_v62 }
 0x6a9   :  { %v880_v22 = vmul.f32 0.2, %v871_v17  ;;  %vm876_vm7 = vcmp.gt.f32.partialorder %v871_v17, 0.0 }
 0x6ab   :  { %v884_v26 = vsel %vm876_vm7, %v871_v17, %v880_v22 }
 0x6ac   :  { %v1648_v53 = vsel %vm888_vm11, %v884_v26, -1e+30  ;;  %v1203_v26 = vld [vmem:[#allocation5 + $0x2] ss:$0 sm:$0xff] }
 0x6ad   :  { %v902_v32 = vsel %vm88_vm0, %v1648_v53, -inf }
 0x6ae   :  { %v1042_v34 = vpop.xlane.xlu1 %1041  ;;  %903 = vmax.xlane.f32.xlu1 %v902_v32 }
 0x6af   :  { %v1043_v36 = vmul.f32 0.17677669, %v1042_v34 }
 0x6b1   :  { %v1050_v40 = vmax.f32 %v1049_v35, %v1043_v36 }
 0x6b3   :  { %v1051_v42 = vmax.f32 %v1050_v40, %v1047_v39 }
 0x6b5   :  { %v1052_v44 = vsub.f32 %v1031_v24, %v1051_v42  ;;  %v1055_v52 = vsub.f32 %v1035_v19, %v1051_v42  ;;  %v1058_v45 = vsub.f32 %v1039_v25, %v1051_v42  ;;  %v1061_v48 = vsub.f32 %v1043_v36, %v1051_v42 }
 0x6b6   :  { %v1064_v55 = vsub.f32 %v1047_v39, %v1051_v42 }
 0x6b7   :  { %v1053_v49 = vmul.f32 1.442695, %v1052_v44  ;;  %v1056_v46 = vmul.f32 1.442695, %v1055_v52  ;;  %v1059_v51 = vmul.f32 1.442695, %v1058_v45 }
 0x6b8   :  { %v1062_v58 = vmul.f32 1.442695, %v1061_v48  ;;  %v1065_v60 = vmul.f32 1.442695, %v1064_v55 }
 0x6b9   :  { %1244 = vpow2.f32 %v1053_v49 }
 0x6ba   :  { %1246 = vpow2.f32 %v1056_v46 }
 0x6bb   :  { %1248 = vpow2.f32 %v1059_v51 }
 0x6bc   :  { %1250 = vpow2.f32 %v1062_v58 }
 0x6bd   :  { %1252 = vpow2.f32 %v1065_v60 }
 0x6bf   :  { %v1245_v61 = vpop.eup %1244 }
 0x6c0   :  { %v1247_v63 = vpop.eup %1246 }
 0x6c1   :  { %v1067_v0 = vadd.f32 %v1247_v63, %v1245_v61  ;;  %v1249_v1 = vpop.eup %1248 }
 0x6c2   :  { %v1251_v3 = vpop.eup %1250 }
 0x6c3   :  { %v1068_v2 = vadd.f32 %v1249_v1, %v1067_v0  ;;  %v1253_v5 = vpop.eup %1252 }
 0x6c5   :  { %v1069_v4 = vadd.f32 %v1251_v3, %v1068_v2 }
 0x6c7   :  { %v1070_v6 = vadd.f32 %v1253_v5, %v1069_v4 }
 0x6c9   :  { %1254 = vrcp.f32 %v1070_v6 }
 0x6cf   :  { %v1255_v7 = vpop.eup %1254 }
 0x6d0   :  { %v1072_v10 = vmul.f32 %v1255_v7, %v1245_v61  ;;  %v1074_v11 = vmul.f32 %v1255_v7, %v1247_v63  ;;  %v1077_v12 = vmul.f32 %v1255_v7, %v1249_v1  ;;  %v1080_v13 = vmul.f32 %v1255_v7, %v1251_v3 }
 0x6d1   :  { %v1083_v56 = vmul.f32 %v1255_v7, %v1253_v5 }
 0x6d2   :  { %v1073_v14 = vmul.f32 %v1072_v10, %v1619_v30  ;;  %v1075_v15 = vmul.f32 %v1074_v11, %v1625_v37  ;;  %v1078_v16 = vmul.f32 %v1077_v12, %v1636_v21  ;;  %v1081_v17 = vmul.f32 %v1080_v13, %v1640_v8 }
 0x6d3   :  { %v1084_v19 = vmul.f32 %v1083_v56, %v1630_v43 }
 0x6d4   :  { %v1076_v27 = vadd.f32 %v1075_v15, %v1073_v14 }
 0x6d6   :  { %v1079_v62 = vadd.f32 %v1078_v16, %v1076_v27 }
 0x6d8   :  { %v1082_v18 = vadd.f32 %v1081_v17, %v1079_v62 }
 0x6da   :  { %v1085_v22 = vadd.f32 %v1084_v19, %v1082_v18 }
 0x6dc   :  { %1134 = vmatmul.f32.vlgmr.msrb.gmra.mxu3 %v1085_v22 }
 0x721   :  { %v904_v23 = vpop.xlane.xlu1 %903 }
 0x722   :  { %v908_v24 = vsub.f32 %v1648_v53, %v904_v23 }
 0x724   :  { %v915_v25 = vmul.f32 1.442695, %v908_v24 }
 0x726   :  { %1256 = vpow2.f32 %v915_v25 }
 0x72c   :  { %v1257_v30 = vpop.eup %1256 }
 0x72d   :  { %v920_v37 = vsel %vm888_vm11, %v1257_v30, 0.0 }
 0x72e   :  { %v930_v21 = vsel %vm88_vm0, %v920_v37, 0.0 }
 0x72f   :  { %931 = vadd.xlane.f32.xlu2 %v930_v21 }
 0x75f   :  { %v1135_v8 = vpop.f32.mrf.mxu3 }
 0x760   :  { %v1156_v31 = vadd.f32 %v1155_v28, %v1135_v8 }
 0x762   :  { %v1160_v32 = vadd.f32 %v1203_v26, %v1156_v31 }
 0x764   :  { %1161 = vmax.xlane.f32.xlu0 %v1160_v32 }
 0x7a2   :  { %v932_v43 = vpop.xlane.xlu2 %931 }
 0x7a3   :  { %v936_v20 = vmax.f32 %v932_v43, 1e-20 }
 0x7a5   :  { %1258 = vrcp.f32 %v936_v20 }
 0x7ab   :  { %v1259_v33 = vpop.eup %1258 }
 0x7ac   :  { %v944_v53 = vmul.f32 %v1259_v33, %v920_v37 }
 0x7ae   :  { %1192 = vmatmul.msk.f32.gmra.mxu1 %vm88_vm0, %v944_v53 }
 0x7d7   :  { %v1162_v34 = vpop.xlane.xlu0 %1161 }
 0x7d8   :  { %v1163_v35 = vsub.f32 %v1160_v32, %v1162_v34 }
 0x7da   :  { %v1164_v9 = vmul.f32 1.442695, %v1163_v35 }
 0x7dc   :  { %1260 = vpow2.f32 %v1164_v9 }
 0x7e2   :  { %v1261_v36 = vpop.eup %1260 }
 0x7e3   :  { %1166 = vadd.xlane.f32.xlu1 %v1261_v36 }
 0x82b   :  { %v982_v54 = vpop.f32.mrf.mxu1 }
 0x856   :  { %v1167_v29 = vpop.xlane.xlu1 %1166 }
 0x857   :  { %1262 = vlog2.f32 %v1167_v29 }
 0x85d   :  { %v1263_v39 = vpop.eup %1262 }
 0x85e   :  { %v1169_v40 = vmul.f32 0.6931472, %v1263_v39 }
 0x860   :  { %v1170_v41 = vsub.f32 %v1163_v35, %v1169_v40 }
 0x862   :  { %1171 = vst [vmem:[%s1672_s7] sm:$0xff] %v1170_v41 }
 0x863   :  { %1176 = vsyncpa [#allocation4], 1 }
 0x864   :  { %1177 = vsyncpa [#allocation6], 1 }

</bundles_post_ra>
